<compile_context>
chip_gen: v5e
topology: v5e:2x2
jax: 0.10.0
libtpu: 0.0.40
codegen_flags: <defaults>
</compile_context>

<pallas_src>
import functools

import jax
import jax.numpy as jnp
from jax.experimental import pallas as pl
from jax.experimental.pallas import tpu as pltpu

DEPTH = 8      # matches the default `depth=8` of the PyTorch module
_LANE = 128
_SUBLANE = 8


def _round_up(v, m):
    return (v + m - 1) // m * m


# --------------------------------------------------------------------------- kernel
def mlp_kernel(x_ref, *refs, depth):
    """One batch tile of the fused depth-layer MLP.

    refs = (w_0..w_{d-1}, b_0..b_{d-1}, out_ref)
      x_ref : (TB, D0p)     bf16
      w_i   : (Dip, Di+1p)  bf16 (zero padded)
      b_i   : (1,  Di+1p)   f32  (zero padded)
      out   : (TB, DLp)
    """
    ws = refs[:depth]
    bs = refs[depth:2 * depth]
    out_ref = refs[2 * depth]

    h = x_ref[...]  # bf16
    # First depth-1 layers: Linear + ReLU (bf16 MXU matmul, f32 accumulate/bias/ReLU).
    for i in range(depth - 1):
        acc = jnp.dot(h, ws[i][...], preferred_element_type=jnp.float32) + bs[i][...]
        h = jnp.maximum(acc, 0.0).astype(jnp.bfloat16)
    # Final layer: Linear only (no activation), matching the PyTorch forward().
    acc = jnp.dot(h, ws[depth - 1][...], preferred_element_type=jnp.float32) + bs[depth - 1][...]
    out_ref[...] = acc.astype(out_ref.dtype)


# ------------------------------------------------------------------- param packing
def prepare_params(weights, biases):
    """Pad every feature dim to a multiple of 128 and cast weights to bf16 ONCE."""
    depth = len(weights)
    assert len(biases) == depth
    dims = [weights[0].shape[0]] + [w.shape[1] for w in weights]
    pdims = [_round_up(d, _LANE) for d in dims]

    ws, bs = [], []
    for i, (w, b) in enumerate(zip(weights, biases)):
        wp = jnp.zeros((pdims[i], pdims[i + 1]), jnp.bfloat16)
        wp = wp.at[:w.shape[0], :w.shape[1]].set(w.astype(jnp.bfloat16))
        bp = jnp.zeros((1, pdims[i + 1]), jnp.float32)
        bp = bp.at[0, :b.shape[-1]].set(b.reshape(-1).astype(jnp.float32))
        ws.append(wp)
        bs.append(bp)
    return {"ws": tuple(ws), "bs": tuple(bs), "dims": tuple(dims), "pdims": tuple(pdims)}


# ------------------------------------------------------------------ VMEM / tile plan
def _vmem_capacity_bytes():
    """Generation-aware VMEM capacity (v5e/v6e: 128 MiB, v7x: 64 MiB per TC)."""
    try:
        return int(pltpu.get_tpu_info().vmem_capacity_bytes)
    except Exception:
        return 64 * 1024 * 1024  # conservative fallback, valid on every generation


def _choose_batch_tile(B, block_batch, per_row_bytes, resident_bytes, vmem_cap):
    """Largest batch tile that fits VMEM with <25% padded rows; split for 2 TCs."""
    b8 = _round_up(B, _SUBLANE)
    block_batch = max(_SUBLANE, _round_up(block_batch, _SUBLANE))
    budget = int(0.8 * vmem_cap) - resident_bytes
    best = _SUBLANE
    for t in (1024, 512, 256, 128, 64, 32, 16, 8):
        tb = min(t, b8, block_batch)
        if tb * per_row_bytes > budget:
            continue
        b_pad = _round_up(B, tb)
        waste_ok = (tb >= b8) or ((b_pad - B) / b_pad <= 0.25)
        if waste_ok:
            best = tb
            break
    # v7x has 2 TensorCores and shards "parallel" grid axes across them: prefer
    # >= 2 tiles for non-tiny batches instead of a single fat tile.
    if _round_up(B, best) // best == 1 and b8 >= 64:
        half = _round_up((b8 + 1) // 2, _SUBLANE)
        if half * per_row_bytes <= budget:
            best = half
    return best


def _vmem_plan(tb, pdims, ws, bs, out_itemsize, single_buffer_consts, vmem_cap):
    """Estimate actual VMEM use and derive a generation-aware vmem_limit_bytes."""
    w_bytes = sum(int(w.size) * w.dtype.itemsize for w in ws)
    b_bytes = sum(int(b.size) * b.dtype.itemsize for b in bs)
    const_buf = 1 if single_buffer_consts else 2
    est = (const_buf * (w_bytes + b_bytes)
           + 2 * tb * pdims[0] * 2                # double-buffered x tiles (bf16)
           + 2 * tb * pdims[-1] * out_itemsize    # double-buffered out tiles
           + tb * max(pdims) * (4 + 2)            # f32 acc + bf16 h working set
           + (1 << 20))                           # compiler scratch slack
    limit = min(int(1.25 * max(est, 32 * 1024 * 1024)), int(0.95 * vmem_cap))
    limit = max(limit, min(est, int(0.95 * vmem_cap)))
    return est, limit


# ----------------------------------------------------------------------- forward
_SINGLE_BUFFER_WEIGHTS = None  # resolved on first call; None = unknown


def mlp_forward(x, params, *, block_batch=512, out_dtype=jnp.float32):
    """Fused, batch-tiled MLP forward. `params` comes from prepare_params()."""
    global _SINGLE_BUFFER_WEIGHTS

    ws, bs = params["ws"], params["bs"]
    dims, pdims = params["dims"], params["pdims"]
    depth = len(ws)
    B, d_in = x.shape
    assert d_in == dims[0]
    d_out = dims[-1]

    vmem_cap = _vmem_capacity_bytes()
    out_itemsize = jnp.dtype(out_dtype).itemsize
    resident = (sum(int(w.size) * w.dtype.itemsize for w in ws)
                + sum(int(b.size) * b.dtype.itemsize for b in bs))
    per_row = 2 * pdims[0] * 2 + 2 * pdims[-1] * out_itemsize + max(pdims) * (4 + 2)
    tb = _choose_batch_tile(B, block_batch, per_row, resident, vmem_cap)
    b_pad = _round_up(B, tb)
    grid = (b_pad // tb,)

    # Pad batch rows + cast x to bf16 (per call; x changes every call, params don't).
    xp = jnp.zeros((b_pad, pdims[0]), jnp.bfloat16)
    xp = xp.at[:B, :d_in].set(x.astype(jnp.bfloat16))

    flops = 2 * b_pad * sum(pdims[i] * pdims[i + 1] for i in range(depth))
    bytes_accessed = xp.size * 2 + resident + b_pad * pdims[-1] * out_itemsize
    cost = pl.CostEstimate(flops=int(flops), transcendentals=0,
                           bytes_accessed=int(bytes_accessed))

    def build(single_buffer):
        # Weights/biases: full-array blocks, constant index_map -> fetched once and
        # VMEM-resident across all batch tiles; single-buffer them when supported.
        const_kw = {"pipeline_mode": pl.Buffered(1)} if single_buffer else {}
        in_specs = [pl.BlockSpec((tb, pdims[0]), lambda i: (i, 0))]
        in_specs += [pl.BlockSpec(w.shape, lambda i: (0, 0), **const_kw) for w in ws]
        in_specs += [pl.BlockSpec(b.shape, lambda i: (0, 0), **const_kw) for b in bs]
        out_spec = pl.BlockSpec((tb, pdims[-1]), lambda i: (i, 0))
        _, vmem_limit = _vmem_plan(tb, pdims, ws, bs, out_itemsize, single_buffer, vmem_cap)
        return pl.pallas_call(
            functools.partial(mlp_kernel, depth=depth),
            out_shape=jax.ShapeDtypeStruct((b_pad, pdims[-1]), out_dtype),
            grid=grid,
            in_specs=in_specs,
            out_specs=out_spec,
            compiler_params=pltpu.CompilerParams(
                dimension_semantics=("parallel",),
                vmem_limit_bytes=int(vmem_limit),
            ),
            cost_estimate=cost,
        )

    modes = ((True, False) if _SINGLE_BUFFER_WEIGHTS is None
             else ((True,) if _SINGLE_BUFFER_WEIGHTS else (False,)))
    out_pad, last_err = None, None
    for single in modes:
        try:
            out_pad = build(single)(xp, *ws, *bs)
            _SINGLE_BUFFER_WEIGHTS = single
            break
        except Exception as err:  # pipeline_mode unsupported -> default double-buffering
            last_err = err
    if out_pad is None:
        raise last_err

    # Padded rows/lanes carry garbage (bias+ReLU on zero inputs) -> slice them off.
    return out_pad[:B, :d_out]


# --------------------------------------------------------------------- init + refs
def init_params(key, input_size, hidden_size, output_size, depth=DEPTH):
    """Deterministic PyTorch-Linear-style init: U(-1/sqrt(fan_in), 1/sqrt(fan_in))."""
    dims = [input_size] + [hidden_size] * (depth - 1) + [output_size]
    weights, biases = [], []
    for i in range(depth):
        fan_in, fan_out = dims[i], dims[i + 1]
        key, wk, bk = jax.random.split(key, 3)
        bound = 1.0 / jnp.sqrt(fan_in)
        weights.append(jax.random.uniform(wk, (fan_in, fan_out), jnp.float32,
                                          minval=-bound, maxval=bound))
        biases.append(jax.random.uniform(bk, (fan_out,), jnp.float32,
                                         minval=-bound, maxval=bound))
    return weights, biases


def mlp_ref_f32(x, weights, biases):
    """Pure-JAX f32 reference (exact forward semantics of the PyTorch module)."""
    depth = len(weights)
    h = x
    for i in range(depth - 1):
        h = jnp.maximum(h @ weights[i] + biases[i][None, :], 0.0)
    return h @ weights[depth - 1] + biases[depth - 1][None, :]


def mlp_ref_bf16(x, weights, biases):
    """Pure-JAX reference applying the same bf16 casts as the kernel."""
    depth = len(weights)
    h = x.astype(jnp.bfloat16)
    for i in range(depth - 1):
        acc = jnp.dot(h, weights[i].astype(jnp.bfloat16),
                      preferred_element_type=jnp.float32) + biases[i][None, :]
        h = jnp.maximum(acc, 0.0).astype(jnp.bfloat16)
    return (jnp.dot(h, weights[depth - 1].astype(jnp.bfloat16),
                    preferred_element_type=jnp.float32) + biases[depth - 1][None, :])


if __name__ == "__main__":
    batch, input_size, hidden_size, output_size = 4, 16, 32, 8

    key = jax.random.PRNGKey(0)
    key, xk = jax.random.split(key)
    x = jax.random.normal(xk, (batch, input_size), jnp.float32)
    weights, biases = init_params(key, input_size, hidden_size, output_size, depth=DEPTH)

    params = prepare_params(weights, biases)   # pad + cast parameters exactly once

    out = mlp_forward(x, params)
    out = jax.block_until_ready(out)

    assert out.shape == (batch, output_size), out.shape
    # Exact-semantics check (same bf16 casts as the kernel, f32 accumulation).
    ref_bf16 = mlp_ref_bf16(x, weights, biases)
    assert jnp.allclose(out, ref_bf16, atol=2e-3, rtol=2e-3), "mismatch vs bf16-matched reference"
    # Loose check against the full-f32 PyTorch-equivalent forward.
    ref_f32 = mlp_ref_f32(x, weights, biases)
    assert jnp.allclose(out, ref_f32, atol=1e-1, rtol=1e-1), "mismatch vs f32 reference"

    print("KERNEL_OK")
</pallas_src>

<mosaic_0001>
module attributes {stable_mosaic.version = 11 : i64} {
  func.func @mlp_kernel(%arg0: i32, %arg1: memref<8x128xbf16, #tpu.memory_space<vmem>>, %arg2: memref<128x128xbf16, #tpu.memory_space<vmem>>, %arg3: memref<128x128xbf16, #tpu.memory_space<vmem>>, %arg4: memref<128x128xbf16, #tpu.memory_space<vmem>>, %arg5: memref<128x128xbf16, #tpu.memory_space<vmem>>, %arg6: memref<128x128xbf16, #tpu.memory_space<vmem>>, %arg7: memref<128x128xbf16, #tpu.memory_space<vmem>>, %arg8: memref<128x128xbf16, #tpu.memory_space<vmem>>, %arg9: memref<128x128xbf16, #tpu.memory_space<vmem>>, %arg10: memref<1x128xf32, #tpu.memory_space<vmem>>, %arg11: memref<1x128xf32, #tpu.memory_space<vmem>>, %arg12: memref<1x128xf32, #tpu.memory_space<vmem>>, %arg13: memref<1x128xf32, #tpu.memory_space<vmem>>, %arg14: memref<1x128xf32, #tpu.memory_space<vmem>>, %arg15: memref<1x128xf32, #tpu.memory_space<vmem>>, %arg16: memref<1x128xf32, #tpu.memory_space<vmem>>, %arg17: memref<1x128xf32, #tpu.memory_space<vmem>>, %arg18: memref<8x128xf32, #tpu.memory_space<vmem>>) attributes {dimension_semantics = [#tpu.dimension_semantics<parallel>], iteration_bounds = array<i64: 1>, scalar_prefetch = 0 : i64, scratch_operands = 0 : i64, tpu.core_type = #tpu.core_type<tc>, window_params = [{transform_indices = @transform_0, window_bounds = array<i64: 8, 128>}, {pipeline_mode = #tpu.pipeline_mode<synchronous>, transform_indices = @transform_1, window_bounds = array<i64: 128, 128>}, {pipeline_mode = #tpu.pipeline_mode<synchronous>, transform_indices = @transform_2, window_bounds = array<i64: 128, 128>}, {pipeline_mode = #tpu.pipeline_mode<synchronous>, transform_indices = @transform_3, window_bounds = array<i64: 128, 128>}, {pipeline_mode = #tpu.pipeline_mode<synchronous>, transform_indices = @transform_4, window_bounds = array<i64: 128, 128>}, {pipeline_mode = #tpu.pipeline_mode<synchronous>, transform_indices = @transform_5, window_bounds = array<i64: 128, 128>}, {pipeline_mode = #tpu.pipeline_mode<synchronous>, transform_indices = @transform_6, window_bounds = array<i64: 128, 128>}, {pipeline_mode = #tpu.pipeline_mode<synchronous>, transform_indices = @transform_7, window_bounds = array<i64: 128, 128>}, {pipeline_mode = #tpu.pipeline_mode<synchronous>, transform_indices = @transform_8, window_bounds = array<i64: 128, 128>}, {pipeline_mode = #tpu.pipeline_mode<synchronous>, transform_indices = @transform_9, window_bounds = array<i64: 1, 128>}, {pipeline_mode = #tpu.pipeline_mode<synchronous>, transform_indices = @transform_10, window_bounds = array<i64: 1, 128>}, {pipeline_mode = #tpu.pipeline_mode<synchronous>, transform_indices = @transform_11, window_bounds = array<i64: 1, 128>}, {pipeline_mode = #tpu.pipeline_mode<synchronous>, transform_indices = @transform_12, window_bounds = array<i64: 1, 128>}, {pipeline_mode = #tpu.pipeline_mode<synchronous>, transform_indices = @transform_13, window_bounds = array<i64: 1, 128>}, {pipeline_mode = #tpu.pipeline_mode<synchronous>, transform_indices = @transform_14, window_bounds = array<i64: 1, 128>}, {pipeline_mode = #tpu.pipeline_mode<synchronous>, transform_indices = @transform_15, window_bounds = array<i64: 1, 128>}, {pipeline_mode = #tpu.pipeline_mode<synchronous>, transform_indices = @transform_16, window_bounds = array<i64: 1, 128>}, {transform_indices = @transform_17, window_bounds = array<i64: 8, 128>}]} {
    %c0 = arith.constant 0 : index
    %c0_0 = arith.constant 0 : index
    %0 = vector.load %arg1[%c0, %c0_0] : memref<8x128xbf16, #tpu.memory_space<vmem>>, vector<8x128xbf16>
    %c0_1 = arith.constant 0 : index
    %c0_2 = arith.constant 0 : index
    %1 = vector.load %arg2[%c0_1, %c0_2] : memref<128x128xbf16, #tpu.memory_space<vmem>>, vector<128x128xbf16>
    %cst = arith.constant dense<0.000000e+00> : vector<8x128xf32>
    %2 = tpu.matmul %0, %1, %cst {dimension_numbers = #tpu.dot_dimension_numbers<[1], [0], [0], [1], [0, 0, 1, 1], [], []>} : vector<8x128xbf16>, vector<128x128xbf16>, vector<8x128xf32> -> vector<8x128xf32>
    %c0_3 = arith.constant 0 : index
    %c0_4 = arith.constant 0 : index
    %3 = vector.load %arg10[%c0_3, %c0_4] : memref<1x128xf32, #tpu.memory_space<vmem>>, vector<1x128xf32>
    %4 = vector.broadcast %3 : vector<1x128xf32> to vector<8x128xf32>
    %5 = arith.addf %2, %4 : vector<8x128xf32>
    %cst_5 = arith.constant 0.000000e+00 : f32
    %6 = vector.broadcast %cst_5 : f32 to vector<8x128xf32>
    %7 = arith.maximumf %5, %6 : vector<8x128xf32>
    %8 = arith.truncf %7 : vector<8x128xf32> to vector<8x128xbf16>
    %c0_6 = arith.constant 0 : index
    %c0_7 = arith.constant 0 : index
    %9 = vector.load %arg3[%c0_6, %c0_7] : memref<128x128xbf16, #tpu.memory_space<vmem>>, vector<128x128xbf16>
    %cst_8 = arith.constant dense<0.000000e+00> : vector<8x128xf32>
    %10 = tpu.matmul %8, %9, %cst_8 {dimension_numbers = #tpu.dot_dimension_numbers<[1], [0], [0], [1], [0, 0, 1, 1], [], []>} : vector<8x128xbf16>, vector<128x128xbf16>, vector<8x128xf32> -> vector<8x128xf32>
    %c0_9 = arith.constant 0 : index
    %c0_10 = arith.constant 0 : index
    %11 = vector.load %arg11[%c0_9, %c0_10] : memref<1x128xf32, #tpu.memory_space<vmem>>, vector<1x128xf32>
    %12 = vector.broadcast %11 : vector<1x128xf32> to vector<8x128xf32>
    %13 = arith.addf %10, %12 : vector<8x128xf32>
    %cst_11 = arith.constant 0.000000e+00 : f32
    %14 = vector.broadcast %cst_11 : f32 to vector<8x128xf32>
    %15 = arith.maximumf %13, %14 : vector<8x128xf32>
    %16 = arith.truncf %15 : vector<8x128xf32> to vector<8x128xbf16>
    %c0_12 = arith.constant 0 : index
    %c0_13 = arith.constant 0 : index
    %17 = vector.load %arg4[%c0_12, %c0_13] : memref<128x128xbf16, #tpu.memory_space<vmem>>, vector<128x128xbf16>
    %cst_14 = arith.constant dense<0.000000e+00> : vector<8x128xf32>
    %18 = tpu.matmul %16, %17, %cst_14 {dimension_numbers = #tpu.dot_dimension_numbers<[1], [0], [0], [1], [0, 0, 1, 1], [], []>} : vector<8x128xbf16>, vector<128x128xbf16>, vector<8x128xf32> -> vector<8x128xf32>
    %c0_15 = arith.constant 0 : index
    %c0_16 = arith.constant 0 : index
    %19 = vector.load %arg12[%c0_15, %c0_16] : memref<1x128xf32, #tpu.memory_space<vmem>>, vector<1x128xf32>
    %20 = vector.broadcast %19 : vector<1x128xf32> to vector<8x128xf32>
    %21 = arith.addf %18, %20 : vector<8x128xf32>
    %cst_17 = arith.constant 0.000000e+00 : f32
    %22 = vector.broadcast %cst_17 : f32 to vector<8x128xf32>
    %23 = arith.maximumf %21, %22 : vector<8x128xf32>
    %24 = arith.truncf %23 : vector<8x128xf32> to vector<8x128xbf16>
    %c0_18 = arith.constant 0 : index
    %c0_19 = arith.constant 0 : index
    %25 = vector.load %arg5[%c0_18, %c0_19] : memref<128x128xbf16, #tpu.memory_space<vmem>>, vector<128x128xbf16>
    %cst_20 = arith.constant dense<0.000000e+00> : vector<8x128xf32>
    %26 = tpu.matmul %24, %25, %cst_20 {dimension_numbers = #tpu.dot_dimension_numbers<[1], [0], [0], [1], [0, 0, 1, 1], [], []>} : vector<8x128xbf16>, vector<128x128xbf16>, vector<8x128xf32> -> vector<8x128xf32>
    %c0_21 = arith.constant 0 : index
    %c0_22 = arith.constant 0 : index
    %27 = vector.load %arg13[%c0_21, %c0_22] : memref<1x128xf32, #tpu.memory_space<vmem>>, vector<1x128xf32>
    %28 = vector.broadcast %27 : vector<1x128xf32> to vector<8x128xf32>
    %29 = arith.addf %26, %28 : vector<8x128xf32>
    %cst_23 = arith.constant 0.000000e+00 : f32
    %30 = vector.broadcast %cst_23 : f32 to vector<8x128xf32>
    %31 = arith.maximumf %29, %30 : vector<8x128xf32>
    %32 = arith.truncf %31 : vector<8x128xf32> to vector<8x128xbf16>
    %c0_24 = arith.constant 0 : index
    %c0_25 = arith.constant 0 : index
    %33 = vector.load %arg6[%c0_24, %c0_25] : memref<128x128xbf16, #tpu.memory_space<vmem>>, vector<128x128xbf16>
    %cst_26 = arith.constant dense<0.000000e+00> : vector<8x128xf32>
    %34 = tpu.matmul %32, %33, %cst_26 {dimension_numbers = #tpu.dot_dimension_numbers<[1], [0], [0], [1], [0, 0, 1, 1], [], []>} : vector<8x128xbf16>, vector<128x128xbf16>, vector<8x128xf32> -> vector<8x128xf32>
    %c0_27 = arith.constant 0 : index
    %c0_28 = arith.constant 0 : index
    %35 = vector.load %arg14[%c0_27, %c0_28] : memref<1x128xf32, #tpu.memory_space<vmem>>, vector<1x128xf32>
    %36 = vector.broadcast %35 : vector<1x128xf32> to vector<8x128xf32>
    %37 = arith.addf %34, %36 : vector<8x128xf32>
    %cst_29 = arith.constant 0.000000e+00 : f32
    %38 = vector.broadcast %cst_29 : f32 to vector<8x128xf32>
    %39 = arith.maximumf %37, %38 : vector<8x128xf32>
    %40 = arith.truncf %39 : vector<8x128xf32> to vector<8x128xbf16>
    %c0_30 = arith.constant 0 : index
    %c0_31 = arith.constant 0 : index
    %41 = vector.load %arg7[%c0_30, %c0_31] : memref<128x128xbf16, #tpu.memory_space<vmem>>, vector<128x128xbf16>
    %cst_32 = arith.constant dense<0.000000e+00> : vector<8x128xf32>
    %42 = tpu.matmul %40, %41, %cst_32 {dimension_numbers = #tpu.dot_dimension_numbers<[1], [0], [0], [1], [0, 0, 1, 1], [], []>} : vector<8x128xbf16>, vector<128x128xbf16>, vector<8x128xf32> -> vector<8x128xf32>
    %c0_33 = arith.constant 0 : index
    %c0_34 = arith.constant 0 : index
    %43 = vector.load %arg15[%c0_33, %c0_34] : memref<1x128xf32, #tpu.memory_space<vmem>>, vector<1x128xf32>
    %44 = vector.broadcast %43 : vector<1x128xf32> to vector<8x128xf32>
    %45 = arith.addf %42, %44 : vector<8x128xf32>
    %cst_35 = arith.constant 0.000000e+00 : f32
    %46 = vector.broadcast %cst_35 : f32 to vector<8x128xf32>
    %47 = arith.maximumf %45, %46 : vector<8x128xf32>
    %48 = arith.truncf %47 : vector<8x128xf32> to vector<8x128xbf16>
    %c0_36 = arith.constant 0 : index
    %c0_37 = arith.constant 0 : index
    %49 = vector.load %arg8[%c0_36, %c0_37] : memref<128x128xbf16, #tpu.memory_space<vmem>>, vector<128x128xbf16>
    %cst_38 = arith.constant dense<0.000000e+00> : vector<8x128xf32>
    %50 = tpu.matmul %48, %49, %cst_38 {dimension_numbers = #tpu.dot_dimension_numbers<[1], [0], [0], [1], [0, 0, 1, 1], [], []>} : vector<8x128xbf16>, vector<128x128xbf16>, vector<8x128xf32> -> vector<8x128xf32>
    %c0_39 = arith.constant 0 : index
    %c0_40 = arith.constant 0 : index
    %51 = vector.load %arg16[%c0_39, %c0_40] : memref<1x128xf32, #tpu.memory_space<vmem>>, vector<1x128xf32>
    %52 = vector.broadcast %51 : vector<1x128xf32> to vector<8x128xf32>
    %53 = arith.addf %50, %52 : vector<8x128xf32>
    %cst_41 = arith.constant 0.000000e+00 : f32
    %54 = vector.broadcast %cst_41 : f32 to vector<8x128xf32>
    %55 = arith.maximumf %53, %54 : vector<8x128xf32>
    %56 = arith.truncf %55 : vector<8x128xf32> to vector<8x128xbf16>
    %c0_42 = arith.constant 0 : index
    %c0_43 = arith.constant 0 : index
    %57 = vector.load %arg9[%c0_42, %c0_43] : memref<128x128xbf16, #tpu.memory_space<vmem>>, vector<128x128xbf16>
    %cst_44 = arith.constant dense<0.000000e+00> : vector<8x128xf32>
    %58 = tpu.matmul %56, %57, %cst_44 {dimension_numbers = #tpu.dot_dimension_numbers<[1], [0], [0], [1], [0, 0, 1, 1], [], []>} : vector<8x128xbf16>, vector<128x128xbf16>, vector<8x128xf32> -> vector<8x128xf32>
    %c0_45 = arith.constant 0 : index
    %c0_46 = arith.constant 0 : index
    %59 = vector.load %arg17[%c0_45, %c0_46] : memref<1x128xf32, #tpu.memory_space<vmem>>, vector<1x128xf32>
    %60 = vector.broadcast %59 : vector<1x128xf32> to vector<8x128xf32>
    %61 = arith.addf %58, %60 : vector<8x128xf32>
    %c0_47 = arith.constant 0 : index
    %c0_48 = arith.constant 0 : index
    %62 = vector.load %arg18[%c0_47, %c0_48] : memref<8x128xf32, #tpu.memory_space<vmem>>, vector<8x128xf32>
    tpu.vector_store %arg18[%c0_47, %c0_48], %61 {strides = array<i32>} : memref<8x128xf32, #tpu.memory_space<vmem>>, vector<8x128xf32>,
    return
  }
  func.func @transform_0(%arg0: i32) -> (i32, i32) {
    %c0_i32 = arith.constant 0 : i32
    %c0_i32_0 = arith.constant 0 : i32
    return %arg0, %c0_i32 : i32, i32
  }
  func.func @transform_1(%arg0: i32) -> (i32, i32) {
    %c0_i32 = arith.constant 0 : i32
    %c0_i32_0 = arith.constant 0 : i32
    %c0_i32_1 = arith.constant 0 : i32
    return %c0_i32, %c0_i32_0 : i32, i32
  }
  func.func @transform_2(%arg0: i32) -> (i32, i32) {
    %c0_i32 = arith.constant 0 : i32
    %c0_i32_0 = arith.constant 0 : i32
    %c0_i32_1 = arith.constant 0 : i32
    return %c0_i32, %c0_i32_0 : i32, i32
  }
  func.func @transform_3(%arg0: i32) -> (i32, i32) {
    %c0_i32 = arith.constant 0 : i32
    %c0_i32_0 = arith.constant 0 : i32
    %c0_i32_1 = arith.constant 0 : i32
    return %c0_i32, %c0_i32_0 : i32, i32
  }
  func.func @transform_4(%arg0: i32) -> (i32, i32) {
    %c0_i32 = arith.constant 0 : i32
    %c0_i32_0 = arith.constant 0 : i32
    %c0_i32_1 = arith.constant 0 : i32
    return %c0_i32, %c0_i32_0 : i32, i32
  }
  func.func @transform_5(%arg0: i32) -> (i32, i32) {
    %c0_i32 = arith.constant 0 : i32
    %c0_i32_0 = arith.constant 0 : i32
    %c0_i32_1 = arith.constant 0 : i32
    return %c0_i32, %c0_i32_0 : i32, i32
  }
  func.func @transform_6(%arg0: i32) -> (i32, i32) {
    %c0_i32 = arith.constant 0 : i32
    %c0_i32_0 = arith.constant 0 : i32
    %c0_i32_1 = arith.constant 0 : i32
    return %c0_i32, %c0_i32_0 : i32, i32
  }
  func.func @transform_7(%arg0: i32) -> (i32, i32) {
    %c0_i32 = arith.constant 0 : i32
    %c0_i32_0 = arith.constant 0 : i32
    %c0_i32_1 = arith.constant 0 : i32
    return %c0_i32, %c0_i32_0 : i32, i32
  }
  func.func @transform_8(%arg0: i32) -> (i32, i32) {
    %c0_i32 = arith.constant 0 : i32
    %c0_i32_0 = arith.constant 0 : i32
    %c0_i32_1 = arith.constant 0 : i32
    return %c0_i32, %c0_i32_0 : i32, i32
  }
  func.func @transform_9(%arg0: i32) -> (i32, i32) {
    %c0_i32 = arith.constant 0 : i32
    %c0_i32_0 = arith.constant 0 : i32
    %c0_i32_1 = arith.constant 0 : i32
    return %c0_i32, %c0_i32_0 : i32, i32
  }
  func.func @transform_10(%arg0: i32) -> (i32, i32) {
    %c0_i32 = arith.constant 0 : i32
    %c0_i32_0 = arith.constant 0 : i32
    %c0_i32_1 = arith.constant 0 : i32
    return %c0_i32, %c0_i32_0 : i32, i32
  }
  func.func @transform_11(%arg0: i32) -> (i32, i32) {
    %c0_i32 = arith.constant 0 : i32
    %c0_i32_0 = arith.constant 0 : i32
    %c0_i32_1 = arith.constant 0 : i32
    return %c0_i32, %c0_i32_0 : i32, i32
  }
  func.func @transform_12(%arg0: i32) -> (i32, i32) {
    %c0_i32 = arith.constant 0 : i32
    %c0_i32_0 = arith.constant 0 : i32
    %c0_i32_1 = arith.constant 0 : i32
    return %c0_i32, %c0_i32_0 : i32, i32
  }
  func.func @transform_13(%arg0: i32) -> (i32, i32) {
    %c0_i32 = arith.constant 0 : i32
    %c0_i32_0 = arith.constant 0 : i32
    %c0_i32_1 = arith.constant 0 : i32
    return %c0_i32, %c0_i32_0 : i32, i32
  }
  func.func @transform_14(%arg0: i32) -> (i32, i32) {
    %c0_i32 = arith.constant 0 : i32
    %c0_i32_0 = arith.constant 0 : i32
    %c0_i32_1 = arith.constant 0 : i32
    return %c0_i32, %c0_i32_0 : i32, i32
  }
  func.func @transform_15(%arg0: i32) -> (i32, i32) {
    %c0_i32 = arith.constant 0 : i32
    %c0_i32_0 = arith.constant 0 : i32
    %c0_i32_1 = arith.constant 0 : i32
    return %c0_i32, %c0_i32_0 : i32, i32
  }
  func.func @transform_16(%arg0: i32) -> (i32, i32) {
    %c0_i32 = arith.constant 0 : i32
    %c0_i32_0 = arith.constant 0 : i32
    %c0_i32_1 = arith.constant 0 : i32
    return %c0_i32, %c0_i32_0 : i32, i32
  }
  func.func @transform_17(%arg0: i32) -> (i32, i32) {
    %c0_i32 = arith.constant 0 : i32
    %c0_i32_0 = arith.constant 0 : i32
    return %arg0, %c0_i32 : i32, i32
  }
}

module attributes {stable_mosaic.version = 11 : i64} {
  func.func @mlp_kernel(%arg0: i32, %arg1: memref<8x128xbf16, #tpu.memory_space<vmem>>, %arg2: memref<128x128xbf16, #tpu.memory_space<vmem>>, %arg3: memref<128x128xbf16, #tpu.memory_space<vmem>>, %arg4: memref<128x128xbf16, #tpu.memory_space<vmem>>, %arg5: memref<128x128xbf16, #tpu.memory_space<vmem>>, %arg6: memref<128x128xbf16, #tpu.memory_space<vmem>>, %arg7: memref<128x128xbf16, #tpu.memory_space<vmem>>, %arg8: memref<128x128xbf16, #tpu.memory_space<vmem>>, %arg9: memref<128x128xbf16, #tpu.memory_space<vmem>>, %arg10: memref<1x128xf32, #tpu.memory_space<vmem>>, %arg11: memref<1x128xf32, #tpu.memory_space<vmem>>, %arg12: memref<1x128xf32, #tpu.memory_space<vmem>>, %arg13: memref<1x128xf32, #tpu.memory_space<vmem>>, %arg14: memref<1x128xf32, #tpu.memory_space<vmem>>, %arg15: memref<1x128xf32, #tpu.memory_space<vmem>>, %arg16: memref<1x128xf32, #tpu.memory_space<vmem>>, %arg17: memref<1x128xf32, #tpu.memory_space<vmem>>, %arg18: memref<8x128xf32, #tpu.memory_space<vmem>>) attributes {dimension_semantics = [#tpu.dimension_semantics<parallel>], iteration_bounds = array<i64: 1>, scalar_prefetch = 0 : i64, scratch_operands = 0 : i64, tpu.core_type = #tpu.core_type<tc>, window_params = [{transform_indices = @transform_0, window_bounds = array<i64: 8, 128>}, {pipeline_mode = #tpu.pipeline_mode<synchronous>, transform_indices = @transform_1, window_bounds = array<i64: 128, 128>}, {pipeline_mode = #tpu.pipeline_mode<synchronous>, transform_indices = @transform_2, window_bounds = array<i64: 128, 128>}, {pipeline_mode = #tpu.pipeline_mode<synchronous>, transform_indices = @transform_3, window_bounds = array<i64: 128, 128>}, {pipeline_mode = #tpu.pipeline_mode<synchronous>, transform_indices = @transform_4, window_bounds = array<i64: 128, 128>}, {pipeline_mode = #tpu.pipeline_mode<synchronous>, transform_indices = @transform_5, window_bounds = array<i64: 128, 128>}, {pipeline_mode = #tpu.pipeline_mode<synchronous>, transform_indices = @transform_6, window_bounds = array<i64: 128, 128>}, {pipeline_mode = #tpu.pipeline_mode<synchronous>, transform_indices = @transform_7, window_bounds = array<i64: 128, 128>}, {pipeline_mode = #tpu.pipeline_mode<synchronous>, transform_indices = @transform_8, window_bounds = array<i64: 128, 128>}, {pipeline_mode = #tpu.pipeline_mode<synchronous>, transform_indices = @transform_9, window_bounds = array<i64: 1, 128>}, {pipeline_mode = #tpu.pipeline_mode<synchronous>, transform_indices = @transform_10, window_bounds = array<i64: 1, 128>}, {pipeline_mode = #tpu.pipeline_mode<synchronous>, transform_indices = @transform_11, window_bounds = array<i64: 1, 128>}, {pipeline_mode = #tpu.pipeline_mode<synchronous>, transform_indices = @transform_12, window_bounds = array<i64: 1, 128>}, {pipeline_mode = #tpu.pipeline_mode<synchronous>, transform_indices = @transform_13, window_bounds = array<i64: 1, 128>}, {pipeline_mode = #tpu.pipeline_mode<synchronous>, transform_indices = @transform_14, window_bounds = array<i64: 1, 128>}, {pipeline_mode = #tpu.pipeline_mode<synchronous>, transform_indices = @transform_15, window_bounds = array<i64: 1, 128>}, {pipeline_mode = #tpu.pipeline_mode<synchronous>, transform_indices = @transform_16, window_bounds = array<i64: 1, 128>}, {transform_indices = @transform_17, window_bounds = array<i64: 8, 128>}]} {
    %c0 = arith.constant 0 : index
    %c0_0 = arith.constant 0 : index
    %0 = vector.load %arg1[%c0, %c0_0] : memref<8x128xbf16, #tpu.memory_space<vmem>>, vector<8x128xbf16>
    %c0_1 = arith.constant 0 : index
    %c0_2 = arith.constant 0 : index
    %1 = vector.load %arg2[%c0_1, %c0_2] : memref<128x128xbf16, #tpu.memory_space<vmem>>, vector<128x128xbf16>
    %cst = arith.constant dense<0.000000e+00> : vector<8x128xf32>
    %2 = tpu.matmul %0, %1, %cst {dimension_numbers = #tpu.dot_dimension_numbers<[1], [0], [0], [1], [0, 0, 1, 1], [], []>} : vector<8x128xbf16>, vector<128x128xbf16>, vector<8x128xf32> -> vector<8x128xf32>
    %c0_3 = arith.constant 0 : index
    %c0_4 = arith.constant 0 : index
    %3 = vector.load %arg10[%c0_3, %c0_4] : memref<1x128xf32, #tpu.memory_space<vmem>>, vector<1x128xf32>
    %4 = vector.broadcast %3 : vector<1x128xf32> to vector<8x128xf32>
    %5 = arith.addf %2, %4 : vector<8x128xf32>
    %cst_5 = arith.constant 0.000000e+00 : f32
    %6 = vector.broadcast %cst_5 : f32 to vector<8x128xf32>
    %7 = arith.maximumf %5, %6 : vector<8x128xf32>
    %8 = arith.truncf %7 : vector<8x128xf32> to vector<8x128xbf16>
    %c0_6 = arith.constant 0 : index
    %c0_7 = arith.constant 0 : index
    %9 = vector.load %arg3[%c0_6, %c0_7] : memref<128x128xbf16, #tpu.memory_space<vmem>>, vector<128x128xbf16>
    %cst_8 = arith.constant dense<0.000000e+00> : vector<8x128xf32>
    %10 = tpu.matmul %8, %9, %cst_8 {dimension_numbers = #tpu.dot_dimension_numbers<[1], [0], [0], [1], [0, 0, 1, 1], [], []>} : vector<8x128xbf16>, vector<128x128xbf16>, vector<8x128xf32> -> vector<8x128xf32>
    %c0_9 = arith.constant 0 : index
    %c0_10 = arith.constant 0 : index
    %11 = vector.load %arg11[%c0_9, %c0_10] : memref<1x128xf32, #tpu.memory_space<vmem>>, vector<1x128xf32>
    %12 = vector.broadcast %11 : vector<1x128xf32> to vector<8x128xf32>
    %13 = arith.addf %10, %12 : vector<8x128xf32>
    %cst_11 = arith.constant 0.000000e+00 : f32
    %14 = vector.broadcast %cst_11 : f32 to vector<8x128xf32>
    %15 = arith.maximumf %13, %14 : vector<8x128xf32>
    %16 = arith.truncf %15 : vector<8x128xf32> to vector<8x128xbf16>
    %c0_12 = arith.constant 0 : index
    %c0_13 = arith.constant 0 : index
    %17 = vector.load %arg4[%c0_12, %c0_13] : memref<128x128xbf16, #tpu.memory_space<vmem>>, vector<128x128xbf16>
    %cst_14 = arith.constant dense<0.000000e+00> : vector<8x128xf32>
    %18 = tpu.matmul %16, %17, %cst_14 {dimension_numbers = #tpu.dot_dimension_numbers<[1], [0], [0], [1], [0, 0, 1, 1], [], []>} : vector<8x128xbf16>, vector<128x128xbf16>, vector<8x128xf32> -> vector<8x128xf32>
    %c0_15 = arith.constant 0 : index
    %c0_16 = arith.constant 0 : index
    %19 = vector.load %arg12[%c0_15, %c0_16] : memref<1x128xf32, #tpu.memory_space<vmem>>, vector<1x128xf32>
    %20 = vector.broadcast %19 : vector<1x128xf32> to vector<8x128xf32>
    %21 = arith.addf %18, %20 : vector<8x128xf32>
    %cst_17 = arith.constant 0.000000e+00 : f32
    %22 = vector.broadcast %cst_17 : f32 to vector<8x128xf32>
    %23 = arith.maximumf %21, %22 : vector<8x128xf32>
    %24 = arith.truncf %23 : vector<8x128xf32> to vector<8x128xbf16>
    %c0_18 = arith.constant 0 : index
    %c0_19 = arith.constant 0 : index
    %25 = vector.load %arg5[%c0_18, %c0_19] : memref<128x128xbf16, #tpu.memory_space<vmem>>, vector<128x128xbf16>
    %cst_20 = arith.constant dense<0.000000e+00> : vector<8x128xf32>
    %26 = tpu.matmul %24, %25, %cst_20 {dimension_numbers = #tpu.dot_dimension_numbers<[1], [0], [0], [1], [0, 0, 1, 1], [], []>} : vector<8x128xbf16>, vector<128x128xbf16>, vector<8x128xf32> -> vector<8x128xf32>
    %c0_21 = arith.constant 0 : index
    %c0_22 = arith.constant 0 : index
    %27 = vector.load %arg13[%c0_21, %c0_22] : memref<1x128xf32, #tpu.memory_space<vmem>>, vector<1x128xf32>
    %28 = vector.broadcast %27 : vector<1x128xf32> to vector<8x128xf32>
    %29 = arith.addf %26, %28 : vector<8x128xf32>
    %cst_23 = arith.constant 0.000000e+00 : f32
    %30 = vector.broadcast %cst_23 : f32 to vector<8x128xf32>
    %31 = arith.maximumf %29, %30 : vector<8x128xf32>
    %32 = arith.truncf %31 : vector<8x128xf32> to vector<8x128xbf16>
    %c0_24 = arith.constant 0 : index
    %c0_25 = arith.constant 0 : index
    %33 = vector.load %arg6[%c0_24, %c0_25] : memref<128x128xbf16, #tpu.memory_space<vmem>>, vector<128x128xbf16>
    %cst_26 = arith.constant dense<0.000000e+00> : vector<8x128xf32>
    %34 = tpu.matmul %32, %33, %cst_26 {dimension_numbers = #tpu.dot_dimension_numbers<[1], [0], [0], [1], [0, 0, 1, 1], [], []>} : vector<8x128xbf16>, vector<128x128xbf16>, vector<8x128xf32> -> vector<8x128xf32>
    %c0_27 = arith.constant 0 : index
    %c0_28 = arith.constant 0 : index
    %35 = vector.load %arg14[%c0_27, %c0_28] : memref<1x128xf32, #tpu.memory_space<vmem>>, vector<1x128xf32>
    %36 = vector.broadcast %35 : vector<1x128xf32> to vector<8x128xf32>
    %37 = arith.addf %34, %36 : vector<8x128xf32>
    %cst_29 = arith.constant 0.000000e+00 : f32
    %38 = vector.broadcast %cst_29 : f32 to vector<8x128xf32>
    %39 = arith.maximumf %37, %38 : vector<8x128xf32>
    %40 = arith.truncf %39 : vector<8x128xf32> to vector<8x128xbf16>
    %c0_30 = arith.constant 0 : index
    %c0_31 = arith.constant 0 : index
    %41 = vector.load %arg7[%c0_30, %c0_31] : memref<128x128xbf16, #tpu.memory_space<vmem>>, vector<128x128xbf16>
    %cst_32 = arith.constant dense<0.000000e+00> : vector<8x128xf32>
    %42 = tpu.matmul %40, %41, %cst_32 {dimension_numbers = #tpu.dot_dimension_numbers<[1], [0], [0], [1], [0, 0, 1, 1], [], []>} : vector<8x128xbf16>, vector<128x128xbf16>, vector<8x128xf32> -> vector<8x128xf32>
    %c0_33 = arith.constant 0 : index
    %c0_34 = arith.constant 0 : index
    %43 = vector.load %arg15[%c0_33, %c0_34] : memref<1x128xf32, #tpu.memory_space<vmem>>, vector<1x128xf32>
    %44 = vector.broadcast %43 : vector<1x128xf32> to vector<8x128xf32>
    %45 = arith.addf %42, %44 : vector<8x128xf32>
    %cst_35 = arith.constant 0.000000e+00 : f32
    %46 = vector.broadcast %cst_35 : f32 to vector<8x128xf32>
    %47 = arith.maximumf %45, %46 : vector<8x128xf32>
    %48 = arith.truncf %47 : vector<8x128xf32> to vector<8x128xbf16>
    %c0_36 = arith.constant 0 : index
    %c0_37 = arith.constant 0 : index
    %49 = vector.load %arg8[%c0_36, %c0_37] : memref<128x128xbf16, #tpu.memory_space<vmem>>, vector<128x128xbf16>
    %cst_38 = arith.constant dense<0.000000e+00> : vector<8x128xf32>
    %50 = tpu.matmul %48, %49, %cst_38 {dimension_numbers = #tpu.dot_dimension_numbers<[1], [0], [0], [1], [0, 0, 1, 1], [], []>} : vector<8x128xbf16>, vector<128x128xbf16>, vector<8x128xf32> -> vector<8x128xf32>
    %c0_39 = arith.constant 0 : index
    %c0_40 = arith.constant 0 : index
    %51 = vector.load %arg16[%c0_39, %c0_40] : memref<1x128xf32, #tpu.memory_space<vmem>>, vector<1x128xf32>
    %52 = vector.broadcast %51 : vector<1x128xf32> to vector<8x128xf32>
    %53 = arith.addf %50, %52 : vector<8x128xf32>
    %cst_41 = arith.constant 0.000000e+00 : f32
    %54 = vector.broadcast %cst_41 : f32 to vector<8x128xf32>
    %55 = arith.maximumf %53, %54 : vector<8x128xf32>
    %56 = arith.truncf %55 : vector<8x128xf32> to vector<8x128xbf16>
    %c0_42 = arith.constant 0 : index
    %c0_43 = arith.constant 0 : index
    %57 = vector.load %arg9[%c0_42, %c0_43] : memref<128x128xbf16, #tpu.memory_space<vmem>>, vector<128x128xbf16>
    %cst_44 = arith.constant dense<0.000000e+00> : vector<8x128xf32>
    %58 = tpu.matmul %56, %57, %cst_44 {dimension_numbers = #tpu.dot_dimension_numbers<[1], [0], [0], [1], [0, 0, 1, 1], [], []>} : vector<8x128xbf16>, vector<128x128xbf16>, vector<8x128xf32> -> vector<8x128xf32>
    %c0_45 = arith.constant 0 : index
    %c0_46 = arith.constant 0 : index
    %59 = vector.load %arg17[%c0_45, %c0_46] : memref<1x128xf32, #tpu.memory_space<vmem>>, vector<1x128xf32>
    %60 = vector.broadcast %59 : vector<1x128xf32> to vector<8x128xf32>
    %61 = arith.addf %58, %60 : vector<8x128xf32>
    %c0_47 = arith.constant 0 : index
    %c0_48 = arith.constant 0 : index
    %62 = vector.load %arg18[%c0_47, %c0_48] : memref<8x128xf32, #tpu.memory_space<vmem>>, vector<8x128xf32>
    tpu.vector_store %arg18[%c0_47, %c0_48], %61 {strides = array<i32>} : memref<8x128xf32, #tpu.memory_space<vmem>>, vector<8x128xf32>,
    return
  }
  func.func @transform_0(%arg0: i32) -> (i32, i32) {
    %c0_i32 = arith.constant 0 : i32
    %c0_i32_0 = arith.constant 0 : i32
    return %arg0, %c0_i32 : i32, i32
  }
  func.func @transform_1(%arg0: i32) -> (i32, i32) {
    %c0_i32 = arith.constant 0 : i32
    %c0_i32_0 = arith.constant 0 : i32
    %c0_i32_1 = arith.constant 0 : i32
    return %c0_i32, %c0_i32_0 : i32, i32
  }
  func.func @transform_2(%arg0: i32) -> (i32, i32) {
    %c0_i32 = arith.constant 0 : i32
    %c0_i32_0 = arith.constant 0 : i32
    %c0_i32_1 = arith.constant 0 : i32
    return %c0_i32, %c0_i32_0 : i32, i32
  }
  func.func @transform_3(%arg0: i32) -> (i32, i32) {
    %c0_i32 = arith.constant 0 : i32
    %c0_i32_0 = arith.constant 0 : i32
    %c0_i32_1 = arith.constant 0 : i32
    return %c0_i32, %c0_i32_0 : i32, i32
  }
  func.func @transform_4(%arg0: i32) -> (i32, i32) {
    %c0_i32 = arith.constant 0 : i32
    %c0_i32_0 = arith.constant 0 : i32
    %c0_i32_1 = arith.constant 0 : i32
    return %c0_i32, %c0_i32_0 : i32, i32
  }
  func.func @transform_5(%arg0: i32) -> (i32, i32) {
    %c0_i32 = arith.constant 0 : i32
    %c0_i32_0 = arith.constant 0 : i32
    %c0_i32_1 = arith.constant 0 : i32
    return %c0_i32, %c0_i32_0 : i32, i32
  }
  func.func @transform_6(%arg0: i32) -> (i32, i32) {
    %c0_i32 = arith.constant 0 : i32
    %c0_i32_0 = arith.constant 0 : i32
    %c0_i32_1 = arith.constant 0 : i32
    return %c0_i32, %c0_i32_0 : i32, i32
  }
  func.func @transform_7(%arg0: i32) -> (i32, i32) {
    %c0_i32 = arith.constant 0 : i32
    %c0_i32_0 = arith.constant 0 : i32
    %c0_i32_1 = arith.constant 0 : i32
    return %c0_i32, %c0_i32_0 : i32, i32
  }
  func.func @transform_8(%arg0: i32) -> (i32, i32) {
    %c0_i32 = arith.constant 0 : i32
    %c0_i32_0 = arith.constant 0 : i32
    %c0_i32_1 = arith.constant 0 : i32
    return %c0_i32, %c0_i32_0 : i32, i32
  }
  func.func @transform_9(%arg0: i32) -> (i32, i32) {
    %c0_i32 = arith.constant 0 : i32
    %c0_i32_0 = arith.constant 0 : i32
    %c0_i32_1 = arith.constant 0 : i32
    return %c0_i32, %c0_i32_0 : i32, i32
  }
  func.func @transform_10(%arg0: i32) -> (i32, i32) {
    %c0_i32 = arith.constant 0 : i32
    %c0_i32_0 = arith.constant 0 : i32
    %c0_i32_1 = arith.constant 0 : i32
    return %c0_i32, %c0_i32_0 : i32, i32
  }
  func.func @transform_11(%arg0: i32) -> (i32, i32) {
    %c0_i32 = arith.constant 0 : i32
    %c0_i32_0 = arith.constant 0 : i32
    %c0_i32_1 = arith.constant 0 : i32
    return %c0_i32, %c0_i32_0 : i32, i32
  }
  func.func @transform_12(%arg0: i32) -> (i32, i32) {
    %c0_i32 = arith.constant 0 : i32
    %c0_i32_0 = arith.constant 0 : i32
    %c0_i32_1 = arith.constant 0 : i32
    return %c0_i32, %c0_i32_0 : i32, i32
  }
  func.func @transform_13(%arg0: i32) -> (i32, i32) {
    %c0_i32 = arith.constant 0 : i32
    %c0_i32_0 = arith.constant 0 : i32
    %c0_i32_1 = arith.constant 0 : i32
    return %c0_i32, %c0_i32_0 : i32, i32
  }
  func.func @transform_14(%arg0: i32) -> (i32, i32) {
    %c0_i32 = arith.constant 0 : i32
    %c0_i32_0 = arith.constant 0 : i32
    %c0_i32_1 = arith.constant 0 : i32
    return %c0_i32, %c0_i32_0 : i32, i32
  }
  func.func @transform_15(%arg0: i32) -> (i32, i32) {
    %c0_i32 = arith.constant 0 : i32
    %c0_i32_0 = arith.constant 0 : i32
    %c0_i32_1 = arith.constant 0 : i32
    return %c0_i32, %c0_i32_0 : i32, i32
  }
  func.func @transform_16(%arg0: i32) -> (i32, i32) {
    %c0_i32 = arith.constant 0 : i32
    %c0_i32_0 = arith.constant 0 : i32
    %c0_i32_1 = arith.constant 0 : i32
    return %c0_i32, %c0_i32_0 : i32, i32
  }
  func.func @transform_17(%arg0: i32) -> (i32, i32) {
    %c0_i32 = arith.constant 0 : i32
    %c0_i32_0 = arith.constant 0 : i32
    return %arg0, %c0_i32 : i32, i32
  }
}

</mosaic_0001>

<bundles_post_ra>
// kernel: tpu_custom_call.1
= control target key start
LH: loop header
LB: loop body
LE: loop exit
PB: predicated region body
PF: predicated region fallthrough
CT: control target
= control target key end

     0   :  { %s1652_s0 = inlined_call_operand.hbm [shape: bf16[8,128], index: 0, kind: input, shape index: {}]   ;;  %s1653_s1 = inlined_call_operand.hbm [shape: bf16[128,128], index: 1, kind: input, shape index: {}]   ;;  %s1654_s2 = inlined_call_operand.hbm [shape: bf16[128,128], index: 2, kind: input, shape index: {}]   ;;  %s1655_s3 = inlined_call_operand.hbm [shape: bf16[128,128], index: 3, kind: input, shape index: {}]   ;;  %s1656_s4 = inlined_call_operand.hbm [shape: bf16[128,128], index: 4, kind: input, shape index: {}]   ;;  %s1657_s5 = inlined_call_operand.hbm [shape: bf16[128,128], index: 5, kind: input, shape index: {}]   ;;  %s1658_s6 = inlined_call_operand.hbm [shape: bf16[128,128], index: 6, kind: input, shape index: {}]   ;;  %s1659_s7 = inlined_call_operand.hbm [shape: bf16[128,128], index: 7, kind: input, shape index: {}]   ;;  %s1660_s8 = inlined_call_operand.hbm [shape: bf16[128,128], index: 8, kind: input, shape index: {}]   ;;  %s1661_s9 = inlined_call_operand.vmem [shape: f32[1,128], index: 9, kind: input, shape index: {}]   ;;  %s1662_s10 = inlined_call_operand.vmem [shape: f32[1,128], index: 10, kind: input, shape index: {}]   ;;  %s1663_s11 = inlined_call_operand.vmem [shape: f32[1,128], index: 11, kind: input, shape index: {}]   ;;  %s1664_s12 = inlined_call_operand.vmem [shape: f32[1,128], index: 12, kind: input, shape index: {}]   ;;  %s1665_s13 = inlined_call_operand.vmem [shape: f32[1,128], index: 13, kind: input, shape index: {}]   ;;  %s1666_s14 = inlined_call_operand.vmem [shape: f32[1,128], index: 14, kind: input, shape index: {}]   ;;  %s1667_s15 = inlined_call_operand.vmem [shape: f32[1,128], index: 15, kind: input, shape index: {}]   ;;  %s1668_s16 = inlined_call_operand.vmem [shape: f32[1,128], index: 16, kind: input, shape index: {}]   ;;  %s1669_s17 = inlined_call_operand.hbm [shape: f32[8,128], index: 17, kind: output, shape index: {}]  }
   0x1   :  { %1670 = sst [smem:[#allocation24_spill]] %s1652_s0 }
   0x2   :  { %1671 = sst [smem:[#allocation25_spill]] %s1653_s1 }
   0x3   :  { %22 = vsyncpa [#allocation3], 0 }
   0x4   :  { %23 = vsyncpa [#allocation6], 0 }
   0x5   :  { %24 = vsyncpa [#allocation9], 0 }
   0x6   :  { %25 = vsyncpa [#allocation12], 0 }
   0x7   :  { %26 = vsyncpa [#allocation15], 0  ;;  %s1672_s26 = sld [smem:[#allocation25_spill]] }
   0xd   :  { %s43_s27 = sshll.u32 %s1672_s26, 4  ;;  %s44_s27 = int_to_ptr.hbm [resolvable:$true] %s43_s27 }
   0xe   :  { %27 = vsyncpa [#allocation4], 0  ;;  %s1472_s28 = smov [#allocation5]   ;;  %s69_s18 = sshll.u32 %s1655_s3, 4  ;;  %s70_s18 = int_to_ptr.hbm [resolvable:$true] %s69_s18 }
   0xf   :  { %s45_s29 = sshll.u32 %s1472_s28, 4  ;;  %s1473_s19 = smov 64   ;;  %s46_s29 = int_to_ptr.vmem [resolvable:$true] %s45_s29 }
  0x10   :  { %s1474_s1 = smov 4   ;;  %s1475_s20 = smov [#allocation8]  }
  0x11   :  { %51 = dma.hbm_to_vmem [thread:$0]  %s44_s27, 1024, %s46_s29, [#allocation6], %s1473_s19, %s1473_s19, %s1474_s1  }
  0x12   :  { %s71_s21 = sshll.u32 %s1475_s20, 4  ;;  %s95_s24 = sshll.u32 %s1657_s5, 4  ;;  %s72_s21 = int_to_ptr.vmem [resolvable:$true] %s71_s21  ;;  %s96_s24 = int_to_ptr.hbm [resolvable:$true] %s95_s24 }
  0x13   :  { %77 = dma.hbm_to_vmem [thread:$0]  %s70_s18, 1024, %s72_s21, [#allocation9], %s1473_s19, %s1473_s19, %s1474_s1  }
  0x14   :  { %s121_s26 = sshll.u32 %s1659_s7, 4  ;;  %s1476_s28 = smov [#allocation11]   ;;  %s122_s26 = int_to_ptr.hbm [resolvable:$true] %s121_s26 }
  0x15   :  { %s97_s0 = sshll.u32 %s1476_s28, 4  ;;  %s1477_s27 = smov [#allocation14]   ;;  %s98_s0 = int_to_ptr.vmem [resolvable:$true] %s97_s0 }
  0x16   :  { %103 = dma.hbm_to_vmem [thread:$0]  %s96_s24, 1024, %s98_s0, [#allocation12], %s1473_s19, %s1473_s19, %s1474_s1  }
  0x17   :  { %s123_s5 = sshll.u32 %s1477_s27, 4  ;;  %s1673_s20 = sld [smem:[#allocation24_spill]]  ;;  %s124_s5 = int_to_ptr.vmem [resolvable:$true] %s123_s5 }
  0x18   :  { %129 = dma.hbm_to_vmem [thread:$0]  %s122_s26, 1024, %s124_s5, [#allocation15], %s1473_s19, %s1473_s19, %s1474_s1  }
  0x19   :  { %s56_s21 = sshll.u32 %s1654_s2, 4  ;;  %s1478_s23 = smov [#allocation2]   ;;  %s57_s21 = int_to_ptr.hbm [resolvable:$true] %s56_s21 }
  0x1a   :  { %s35_s3 = sshll.u32 %s1478_s23, 4  ;;  %s1479_s24 = smov [#allocation7]   ;;  %s36_s3 = int_to_ptr.vmem [resolvable:$true] %s35_s3 }
  0x1b   :  { %s58_s25 = sshll.u32 %s1479_s24, 4  ;;  %s82_s27 = sshll.u32 %s1656_s4, 4  ;;  %s59_s25 = int_to_ptr.vmem [resolvable:$true] %s58_s25  ;;  %s83_s27 = int_to_ptr.hbm [resolvable:$true] %s82_s27 }
  0x1c   :  { %64 = dma.hbm_to_vmem [thread:$0]  %s57_s21, 1024, %s59_s25, [#allocation6], %s1473_s19, %s1473_s19, %s1474_s1  }
  0x1d   :  { %s33_s22 = sshll.u32 %s1673_s20, 4  ;;  %s108_s2 = sshll.u32 %s1658_s6, 4  ;;  %s34_s22 = int_to_ptr.hbm [resolvable:$true] %s33_s22  ;;  %s109_s2 = int_to_ptr.hbm [resolvable:$true] %s108_s2 }
  0x1e   :  { %38 = dma.hbm_to_vmem [thread:$0]  %s34_s22, 64, %s36_s3, [#allocation3]  }
  0x1f   :  { %s1480_s29 = smov [#allocation10]   ;;  %s1481_s20 = smov [#allocation13]  }
  0x20   :  { %s84_s30 = sshll.u32 %s1480_s29, 4  ;;  %s110_s4 = sshll.u32 %s1481_s20, 4  ;;  %s85_s30 = int_to_ptr.vmem [resolvable:$true] %s84_s30  ;;  %s111_s4 = int_to_ptr.vmem [resolvable:$true] %s110_s4 }
  0x21   :  { %90 = dma.hbm_to_vmem [thread:$0]  %s83_s27, 1024, %s85_s30, [#allocation9], %s1473_s19, %s1473_s19, %s1474_s1  }
  0x22   :  { %s134_s18 = sshll.u32 %s1660_s8, 4  ;;  %s1482_s6 = smov [#allocation16]   ;;  %s135_s18 = int_to_ptr.hbm [resolvable:$true] %s134_s18 }
  0x23   :  { %116 = dma.hbm_to_vmem [thread:$0]  %s109_s2, 1024, %s111_s4, [#allocation12], %s1473_s19, %s1473_s19, %s1474_s1  }
  0x24   :  { %s136_s21 = sshll.u32 %s1482_s6, 4  ;;  %s137_s21 = int_to_ptr.vmem [resolvable:$true] %s136_s21 }
  0x25   :  { %142 = dma.hbm_to_vmem [thread:$0]  %s135_s18, 1024, %s137_s21, [#allocation15], %s1473_s19, %s1473_s19, %s1474_s1  }
  0x26   :  { %1460 = dma.done.wait [#allocation3], 64  }
  0x27   :  { %1461 = vsyncadd [#allocation3], 4294967232 }
  0x28   :  { %1462 = dma.done.wait [#allocation6], 2048  }
  0x29   :  { %1463 = vsyncadd [#allocation6], 4294965248 }
  0x2a   :  { %1464 = dma.done.wait [#allocation9], 2048  }
  0x2b   :  { %1465 = vsyncadd [#allocation9], 4294965248 }
  0x2c   :  { %1466 = dma.done.wait [#allocation12], 2048  }
  0x2d   :  { %1467 = vsyncadd [#allocation12], 4294965248 }
  0x2e   :  { %1468 = dma.done.wait [#allocation15], 2048  }
  0x2f   :  { %1469 = vsyncadd [#allocation15], 4294965248  ;;  %v1143_v0 = vld [vmem:[#allocation5 + $0x38] sm:$0xff]  ;;  %v1142_v1 = vld [vmem:[#allocation5 + $0x30] sm:$0xff]  ;;  %s1483_s26 = smov [#allocation17]   ;;  %s866_s30 = sshll.u32 %s1669_s17, 4  ;;  %s867_s30 = int_to_ptr.hbm [resolvable:$true] %s866_s30 }
  0x30   :  { %264 = vmatpush.bf16.msra.mxu0 %v1143_v0  ;;  %v1151_v2 = vld [vmem:[#allocation7 + $0x38] sm:$0xff]  ;;  %v1141_v3 = vld [vmem:[#allocation5 + $0x28] sm:$0xff]  ;;  %v1150_v4 = vld [vmem:[#allocation7 + $0x30] sm:$0xff]  ;;  %s864_s5 = sshll.u32 %s1483_s26, 4  ;;  %s865_s5 = int_to_ptr.vmem [resolvable:$true] %s864_s5 }
  0x31   :  { %347 = vmatpush.bf16.msra.mxu1 %v1151_v2  ;;  %v1149_v5 = vld [vmem:[#allocation7 + $0x28] sm:$0xff]  ;;  %v1140_v6 = vld [vmem:[#allocation5 + $0x20] sm:$0xff]  ;;  %v1139_v8 = vld [vmem:[#allocation5 + $0x18] sm:$0xff] }
  0x32   :  { %v1148_v7 = vld [vmem:[#allocation7 + $0x20] sm:$0xff]  ;;  %v1147_v9 = vld [vmem:[#allocation7 + $0x18] sm:$0xff]  ;;  %v1138_v10 = vld [vmem:[#allocation5 + $0x10] sm:$0xff] }
  0x33   :  { %v1146_v11 = vld [vmem:[#allocation7 + $0x10] sm:$0xff]  ;;  %v1137_v12 = vld [vmem:[#allocation5 + $0x8] sm:$0xff]  ;;  %v1136_v13 = vld [vmem:[#allocation5] sm:$0xff] }
  0x34   :  { %265 = vmatpush.bf16.msra.mxu0 %v1142_v1  ;;  %v195_v14 = vld [vmem:[#allocation2] sm:$0xf]  ;;  %v1145_v15 = vld [vmem:[#allocation7 + $0x8] sm:$0xff]  ;;  %v1144_v16 = vld [vmem:[#allocation7] sm:$0xff] }
  0x35   :  { %348 = vmatpush.bf16.msra.mxu1 %v1150_v4  ;;  %v1159_v17 = vld [vmem:[#allocation8 + $0x38] sm:$0xff]  ;;  %v1158_v18 = vld [vmem:[#allocation8 + $0x30] sm:$0xff]  ;;  %v1157_v19 = vld [vmem:[#allocation8 + $0x28] sm:$0xff] }
  0x36   :  { %430 = vmatpush.bf16.msra.mxu2 %v1159_v17  ;;  %v1156_v20 = vld [vmem:[#allocation8 + $0x20] sm:$0xff]  ;;  %v1155_v21 = vld [vmem:[#allocation8 + $0x18] sm:$0xff]  ;;  %v1154_v22 = vld [vmem:[#allocation8 + $0x10] sm:$0xff] }
  0x37   :  { %v1212_v23 = vld [vmem:[%s1661_s9] ss:$0 sm:$0xff]  ;;  %v1153_v29 = vld [vmem:[#allocation8 + $0x8] sm:$0xff]  ;;  %v1152_v30 = vld [vmem:[#allocation8] sm:$0xff] }
  0x38   :  { %266 = vmatpush.bf16.msra.mxu0 %v1141_v3  ;;  %v1167_v31 = vld [vmem:[#allocation10 + $0x38] sm:$0xff]  ;;  %v1166_v32 = vld [vmem:[#allocation10 + $0x30] sm:$0xff]  ;;  %v1165_v33 = vld [vmem:[#allocation10 + $0x28] sm:$0xff] }
  0x39   :  { %349 = vmatpush.bf16.msra.mxu1 %v1149_v5  ;;  %513 = vmatpush.bf16.msra.mxu3 %v1167_v31  ;;  %v1164_v34 = vld [vmem:[#allocation10 + $0x20] sm:$0xff]  ;;  %v1163_v35 = vld [vmem:[#allocation10 + $0x18] sm:$0xff]  ;;  %v1162_v36 = vld [vmem:[#allocation10 + $0x10] sm:$0xff] }
  0x3a   :  { %431 = vmatpush.bf16.msra.mxu2 %v1158_v18  ;;  %v1213_v37 = vld [vmem:[%s1662_s10] ss:$0 sm:$0xff]  ;;  %v1161_v43 = vld [vmem:[#allocation10 + $0x8] sm:$0xff]  ;;  %v1160_v44 = vld [vmem:[#allocation10] sm:$0xff] }
  0x3b   :  { %v1175_v45 = vld [vmem:[#allocation11 + $0x38] sm:$0xff]  ;;  %v1174_v46 = vld [vmem:[#allocation11 + $0x30] sm:$0xff]  ;;  %v1173_v47 = vld [vmem:[#allocation11 + $0x28] sm:$0xff] }
  0x3c   :  { %267 = vmatpush.bf16.msra.mxu0 %v1140_v6  ;;  %v1172_v48 = vld [vmem:[#allocation11 + $0x20] sm:$0xff]  ;;  %v1171_v49 = vld [vmem:[#allocation11 + $0x18] sm:$0xff]  ;;  %v1170_v50 = vld [vmem:[#allocation11 + $0x10] sm:$0xff] }
  0x3d   :  { %350 = vmatpush.bf16.msra.mxu1 %v1148_v7  ;;  %514 = vmatpush.bf16.msra.mxu3 %v1166_v32  ;;  %v1214_v51 = vld [vmem:[%s1663_s11] ss:$0 sm:$0xff]  ;;  %v1169_v57 = vld [vmem:[#allocation11 + $0x8] sm:$0xff]  ;;  %v1168_v58 = vld [vmem:[#allocation11] sm:$0xff] }
  0x3e   :  { %432 = vmatpush.bf16.msra.mxu2 %v1157_v19  ;;  %v1183_v59 = vld [vmem:[#allocation13 + $0x38] sm:$0xff]  ;;  %v1182_v60 = vld [vmem:[#allocation13 + $0x30] sm:$0xff]  ;;  %v1181_v61 = vld [vmem:[#allocation13 + $0x28] sm:$0xff] }
  0x3f   :  { %v1180_v62 = vld [vmem:[#allocation13 + $0x20] sm:$0xff]  ;;  %v1179_v63 = vld [vmem:[#allocation13 + $0x18] sm:$0xff]  ;;  %v1178_v0 = vld [vmem:[#allocation13 + $0x10] sm:$0xff] }
  0x40   :  { %268 = vmatpush.bf16.msra.mxu0 %v1139_v8  ;;  %v1215_v1 = vld [vmem:[%s1664_s12] ss:$0 sm:$0xff]  ;;  %v1177_v7 = vld [vmem:[#allocation13 + $0x8] sm:$0xff]  ;;  %v1176_v8 = vld [vmem:[#allocation13] sm:$0xff] }
  0x41   :  { %351 = vmatpush.bf16.msra.mxu1 %v1147_v9  ;;  %515 = vmatpush.bf16.msra.mxu3 %v1165_v33  ;;  %v1191_v9 = vld [vmem:[#allocation14 + $0x38] sm:$0xff] }
  0x42   :  { %433 = vmatpush.bf16.msra.mxu2 %v1156_v20 }
  0x44   :  { %269 = vmatpush.bf16.msra.mxu0 %v1138_v10  ;;  %v1190_v10 = vld [vmem:[#allocation14 + $0x30] sm:$0xff] }
  0x45   :  { %352 = vmatpush.bf16.msra.mxu1 %v1146_v11  ;;  %516 = vmatpush.bf16.msra.mxu3 %v1164_v34  ;;  %v1189_v11 = vld [vmem:[#allocation14 + $0x28] sm:$0xff] }
  0x46   :  { %434 = vmatpush.bf16.msra.mxu2 %v1155_v21  ;;  %v1185_v21 = vld [vmem:[#allocation14 + $0x8] sm:$0xff] }
  0x48   :  { %270 = vmatpush.bf16.msra.mxu0 %v1137_v12  ;;  %v1188_v12 = vld [vmem:[#allocation14 + $0x20] sm:$0xff] }
  0x49   :  { %353 = vmatpush.bf16.msra.mxu1 %v1145_v15  ;;  %517 = vmatpush.bf16.msra.mxu3 %v1163_v35  ;;  %v1216_v15 = vld [vmem:[%s1665_s13] ss:$0 sm:$0xff]  ;;  %v1193_v35 = vld [vmem:[#allocation16 + $0x8] sm:$0xff] }
  0x4a   :  { %435 = vmatpush.bf16.msra.mxu2 %v1154_v22  ;;  %v1184_v22 = vld [vmem:[#allocation14] sm:$0xff] }
  0x4c   :  { %271 = vmatpush.bf16.msra.mxu0 %v1136_v13  ;;  %v1187_v13 = vld [vmem:[#allocation14 + $0x18] sm:$0xff] }
  0x4d   :  { %354 = vmatpush.bf16.msra.mxu1 %v1144_v16  ;;  %518 = vmatpush.bf16.msra.mxu3 %v1162_v36  ;;  %v1192_v36 = vld [vmem:[#allocation16] sm:$0xff] }
  0x4e   :  { %436 = vmatpush.bf16.msra.mxu2 %v1153_v29  ;;  %v1217_v29 = vld [vmem:[%s1666_s14] ss:$0 sm:$0xff] }
  0x4f   :  { %272 = vmatmul.bf16.vlgmr.msra.gmra.mxu0 %v195_v14  ;;  %v1186_v14 = vld [vmem:[#allocation14 + $0x10] sm:$0xff] }
  0x50   :  { %596 = vmatpush.bf16.msrb.mxu0 %v1175_v45 }
  0x51   :  { %519 = vmatpush.bf16.msra.mxu3 %v1161_v43  ;;  %679 = vmatpush.bf16.msrb.mxu1 %v1183_v59  ;;  %v1219_v43 = vld [vmem:[%s1668_s16] ss:$0 sm:$0xff] }
  0x52   :  { %437 = vmatpush.bf16.msra.mxu2 %v1152_v30 }
  0x54   :  { %597 = vmatpush.bf16.msrb.mxu0 %v1174_v46 }
  0x55   :  { %520 = vmatpush.bf16.msra.mxu3 %v1160_v44  ;;  %680 = vmatpush.bf16.msrb.mxu1 %v1182_v60 }
  0x56   :  { %762 = vmatpush.bf16.msrb.mxu2 %v1191_v9 }
  0x58   :  { %598 = vmatpush.bf16.msrb.mxu0 %v1173_v47 }
  0x59   :  { %681 = vmatpush.bf16.msrb.mxu1 %v1181_v61 }
  0x5a   :  { %763 = vmatpush.bf16.msrb.mxu2 %v1190_v10 }
  0x5c   :  { %599 = vmatpush.bf16.msrb.mxu0 %v1172_v48 }
  0x5d   :  { %682 = vmatpush.bf16.msrb.mxu1 %v1180_v62 }
  0x5e   :  { %764 = vmatpush.bf16.msrb.mxu2 %v1189_v11 }
  0x60   :  { %600 = vmatpush.bf16.msrb.mxu0 %v1171_v49 }
  0x61   :  { %683 = vmatpush.bf16.msrb.mxu1 %v1179_v63 }
  0x62   :  { %765 = vmatpush.bf16.msrb.mxu2 %v1188_v12 }
  0x64   :  { %601 = vmatpush.bf16.msrb.mxu0 %v1170_v50 }
  0x65   :  { %684 = vmatpush.bf16.msrb.mxu1 %v1178_v0 }
  0x66   :  { %766 = vmatpush.bf16.msrb.mxu2 %v1187_v13 }
  0x68   :  { %602 = vmatpush.bf16.msrb.mxu0 %v1169_v57 }
  0x69   :  { %685 = vmatpush.bf16.msrb.mxu1 %v1177_v7 }
  0x6a   :  { %767 = vmatpush.bf16.msrb.mxu2 %v1186_v14 }
  0x6c   :  { %603 = vmatpush.bf16.msrb.mxu0 %v1168_v58 }
  0x6d   :  { %686 = vmatpush.bf16.msrb.mxu1 %v1176_v8 }
  0x6e   :  { %768 = vmatpush.bf16.msrb.mxu2 %v1185_v21 }
  0x72   :  { %769 = vmatpush.bf16.msrb.mxu2 %v1184_v22 }
  0xcc   :  { %v273_v24 = vpop.f32.mrf.mxu0 }
  0xcd   :  { %v274_v25 = vadd.f32 %v1212_v23, %v273_v24  ;;  %v1199_v23 = vld [vmem:[#allocation16 + $0x38] sm:$0xff]  ;;  %v1198_v24 = vld [vmem:[#allocation16 + $0x30] sm:$0xff] }
  0xce   :  { %845 = vmatpush.bf16.msrb.mxu3 %v1199_v23 }
  0xcf   :  { %v277_v26 = vmax.f32 %v274_v25, 0.0  ;;  %v1197_v25 = vld [vmem:[#allocation16 + $0x28] sm:$0xff] }
  0xd1   :  { %v278_v27 = vpack.c.bf16 %v277_v26, %v277_v26  ;;  %v1196_v26 = vld [vmem:[#allocation16 + $0x20] sm:$0xff] }
  0xd2   :  { %846 = vmatpush.bf16.msrb.mxu3 %v1198_v24 }
  0xd3   :  { %355 = vmatmul.bf16.vlgmr.msra.gmra.mxu1 %v278_v27  ;;  %v1195_v27 = vld [vmem:[#allocation16 + $0x18] sm:$0xff] }
  0xd4   :  { %v275_v28 = vpop.f32.mrf.mxu0 }
  0xd5   :  { %v1194_v28 = vld [vmem:[#allocation16 + $0x10] sm:$0xff] }
  0xd6   :  { %847 = vmatpush.bf16.msrb.mxu3 %v1197_v25 }
  0xda   :  { %848 = vmatpush.bf16.msrb.mxu3 %v1196_v26 }
  0xde   :  { %849 = vmatpush.bf16.msrb.mxu3 %v1195_v27 }
  0xe2   :  { %850 = vmatpush.bf16.msrb.mxu3 %v1194_v28 }
  0xe6   :  { %851 = vmatpush.bf16.msrb.mxu3 %v1193_v35 }
  0xea   :  { %852 = vmatpush.bf16.msrb.mxu3 %v1192_v36 }
 0x150   :  { %v356_v38 = vpop.f32.mrf.mxu1 }
 0x151   :  { %v357_v39 = vadd.f32 %v1213_v37, %v356_v38  ;;  %v1218_v37 = vld [vmem:[%s1667_s15] ss:$0 sm:$0xff] }
 0x153   :  { %v360_v40 = vmax.f32 %v357_v39, 0.0 }
 0x155   :  { %v361_v41 = vpack.c.bf16 %v360_v40, %v360_v40 }
 0x157   :  { %438 = vmatmul.bf16.vlgmr.msra.gmra.mxu2 %v361_v41 }
 0x158   :  { %v358_v42 = vpop.f32.mrf.mxu1 }
 0x1da   :  { %v439_v52 = vpop.f32.mrf.mxu2 }
 0x1db   :  { %v440_v53 = vadd.f32 %v1214_v51, %v439_v52 }
 0x1dd   :  { %v443_v54 = vmax.f32 %v440_v53, 0.0 }
 0x1df   :  { %v444_v55 = vpack.c.bf16 %v443_v54, %v443_v54 }
 0x1e1   :  { %521 = vmatmul.bf16.vlgmr.msra.gmra.mxu3 %v444_v55 }
 0x1e2   :  { %v441_v56 = vpop.f32.mrf.mxu2 }
 0x264   :  { %v522_v2 = vpop.f32.mrf.mxu3 }
 0x265   :  { %v523_v3 = vadd.f32 %v1215_v1, %v522_v2 }
 0x267   :  { %v526_v4 = vmax.f32 %v523_v3, 0.0 }
 0x269   :  { %v527_v5 = vpack.c.bf16 %v526_v4, %v526_v4 }
 0x26b   :  { %604 = vmatmul.bf16.vlgmr.msrb.gmra.mxu0 %v527_v5 }
 0x26c   :  { %v524_v6 = vpop.f32.mrf.mxu3 }
 0x2e8   :  { %v605_v16 = vpop.f32.mrf.mxu0 }
 0x2e9   :  { %v606_v17 = vadd.f32 %v1216_v15, %v605_v16 }
 0x2eb   :  { %v609_v18 = vmax.f32 %v606_v17, 0.0 }
 0x2ed   :  { %v610_v19 = vpack.c.bf16 %v609_v18, %v609_v18 }
 0x2ef   :  { %687 = vmatmul.bf16.vlgmr.msrb.gmra.mxu1 %v610_v19 }
 0x2f0   :  { %v607_v20 = vpop.f32.mrf.mxu0 }
 0x36c   :  { %v688_v30 = vpop.f32.mrf.mxu1 }
 0x36d   :  { %v689_v31 = vadd.f32 %v1217_v29, %v688_v30 }
 0x36f   :  { %v692_v32 = vmax.f32 %v689_v31, 0.0 }
 0x371   :  { %v693_v33 = vpack.c.bf16 %v692_v32, %v692_v32 }
 0x373   :  { %770 = vmatmul.bf16.vlgmr.msrb.gmra.mxu2 %v693_v33 }
 0x374   :  { %v690_v34 = vpop.f32.mrf.mxu1 }
 0x3f6   :  { %v771_v38 = vpop.f32.mrf.mxu2 }
 0x3f7   :  { %v772_v39 = vadd.f32 %v1218_v37, %v771_v38 }
 0x3f9   :  { %v775_v40 = vmax.f32 %v772_v39, 0.0 }
 0x3fb   :  { %v776_v41 = vpack.c.bf16 %v775_v40, %v775_v40 }
 0x3fd   :  { %853 = vmatmul.bf16.vlgmr.msrb.gmra.mxu3 %v776_v41 }
 0x3fe   :  { %v773_v42 = vpop.f32.mrf.mxu2 }
 0x480   :  { %v854_v44 = vpop.f32.mrf.mxu3 }
 0x481   :  { %v855_v45 = vadd.f32 %v1219_v43, %v854_v44 }
 0x483   :  { %858 = vst [vmem:[#allocation17] sm:$0xff] %v855_v45 }
 0x484   :  { %869 = dma.vmem_to_hbm [thread:$0]  %s865_s5, 128, %s867_s30, [#allocation4]  }
 0x488   :  { %v856_v46 = vpop.f32.mrf.mxu3 }
 0x489   :  { %1470 = dma.done.wait [#allocation4], 128  }
 0x48a   :  { %1471 = vsyncadd [#allocation4], 4294967168 }
 0x48b   :  { %874 = vsyncpa [#allocation3], 1 }
 0x48c   :  { %875 = vsyncpa [#allocation6], 1 }
 0x48d   :  { %876 = vsyncpa [#allocation9], 1 }
 0x48e   :  { %877 = vsyncpa [#allocation12], 1 }
 0x48f   :  { %878 = vsyncpa [#allocation15], 1 }
 0x490   :  { %879 = vsyncpa [#allocation4], 1 }

// kernel: tpu_custom_call.1
= control target key start
LH: loop header
LB: loop body
LE: loop exit
PB: predicated region body
PF: predicated region fallthrough
CT: control target
= control target key end

     0   :  { %s1652_s0 = inlined_call_operand.hbm [shape: bf16[8,128], index: 0, kind: input, shape index: {}]   ;;  %s1653_s1 = inlined_call_operand.hbm [shape: bf16[128,128], index: 1, kind: input, shape index: {}]   ;;  %s1654_s2 = inlined_call_operand.hbm [shape: bf16[128,128], index: 2, kind: input, shape index: {}]   ;;  %s1655_s3 = inlined_call_operand.hbm [shape: bf16[128,128], index: 3, kind: input, shape index: {}]   ;;  %s1656_s4 = inlined_call_operand.hbm [shape: bf16[128,128], index: 4, kind: input, shape index: {}]   ;;  %s1657_s5 = inlined_call_operand.hbm [shape: bf16[128,128], index: 5, kind: input, shape index: {}]   ;;  %s1658_s6 = inlined_call_operand.hbm [shape: bf16[128,128], index: 6, kind: input, shape index: {}]   ;;  %s1659_s7 = inlined_call_operand.hbm [shape: bf16[128,128], index: 7, kind: input, shape index: {}]   ;;  %s1660_s8 = inlined_call_operand.hbm [shape: bf16[128,128], index: 8, kind: input, shape index: {}]   ;;  %s1661_s9 = inlined_call_operand.vmem [shape: f32[1,128], index: 9, kind: input, shape index: {}]   ;;  %s1662_s10 = inlined_call_operand.vmem [shape: f32[1,128], index: 10, kind: input, shape index: {}]   ;;  %s1663_s11 = inlined_call_operand.vmem [shape: f32[1,128], index: 11, kind: input, shape index: {}]   ;;  %s1664_s12 = inlined_call_operand.vmem [shape: f32[1,128], index: 12, kind: input, shape index: {}]   ;;  %s1665_s13 = inlined_call_operand.vmem [shape: f32[1,128], index: 13, kind: input, shape index: {}]   ;;  %s1666_s14 = inlined_call_operand.vmem [shape: f32[1,128], index: 14, kind: input, shape index: {}]   ;;  %s1667_s15 = inlined_call_operand.vmem [shape: f32[1,128], index: 15, kind: input, shape index: {}]   ;;  %s1668_s16 = inlined_call_operand.vmem [shape: f32[1,128], index: 16, kind: input, shape index: {}]   ;;  %s1669_s17 = inlined_call_operand.hbm [shape: f32[8,128], index: 17, kind: output, shape index: {}]  }
   0x1   :  { %1670 = sst [smem:[#allocation24_spill]] %s1652_s0 }
   0x2   :  { %1671 = sst [smem:[#allocation25_spill]] %s1653_s1 }
   0x3   :  { %22 = vsyncpa [#allocation3], 0 }
   0x4   :  { %23 = vsyncpa [#allocation6], 0 }
   0x5   :  { %24 = vsyncpa [#allocation9], 0 }
   0x6   :  { %25 = vsyncpa [#allocation12], 0 }
   0x7   :  { %26 = vsyncpa [#allocation15], 0  ;;  %s1672_s26 = sld [smem:[#allocation25_spill]] }
   0xd   :  { %s43_s27 = sshll.u32 %s1672_s26, 4  ;;  %s44_s27 = int_to_ptr.hbm [resolvable:$true] %s43_s27 }
   0xe   :  { %27 = vsyncpa [#allocation4], 0  ;;  %s1472_s28 = smov [#allocation5]   ;;  %s69_s18 = sshll.u32 %s1655_s3, 4  ;;  %s70_s18 = int_to_ptr.hbm [resolvable:$true] %s69_s18 }
   0xf   :  { %s45_s29 = sshll.u32 %s1472_s28, 4  ;;  %s1473_s19 = smov 64   ;;  %s46_s29 = int_to_ptr.vmem [resolvable:$true] %s45_s29 }
  0x10   :  { %s1474_s1 = smov 4   ;;  %s1475_s20 = smov [#allocation8]  }
  0x11   :  { %51 = dma.hbm_to_vmem [thread:$0]  %s44_s27, 1024, %s46_s29, [#allocation6], %s1473_s19, %s1473_s19, %s1474_s1  }
  0x12   :  { %s71_s21 = sshll.u32 %s1475_s20, 4  ;;  %s95_s24 = sshll.u32 %s1657_s5, 4  ;;  %s72_s21 = int_to_ptr.vmem [resolvable:$true] %s71_s21  ;;  %s96_s24 = int_to_ptr.hbm [resolvable:$true] %s95_s24 }
  0x13   :  { %77 = dma.hbm_to_vmem [thread:$0]  %s70_s18, 1024, %s72_s21, [#allocation9], %s1473_s19, %s1473_s19, %s1474_s1  }
  0x14   :  { %s121_s26 = sshll.u32 %s1659_s7, 4  ;;  %s1476_s28 = smov [#allocation11]   ;;  %s122_s26 = int_to_ptr.hbm [resolvable:$true] %s121_s26 }
  0x15   :  { %s97_s0 = sshll.u32 %s1476_s28, 4  ;;  %s1477_s27 = smov [#allocation14]   ;;  %s98_s0 = int_to_ptr.vmem [resolvable:$true] %s97_s0 }
  0x16   :  { %103 = dma.hbm_to_vmem [thread:$0]  %s96_s24, 1024, %s98_s0, [#allocation12], %s1473_s19, %s1473_s19, %s1474_s1  }
  0x17   :  { %s123_s5 = sshll.u32 %s1477_s27, 4  ;;  %s1673_s20 = sld [smem:[#allocation24_spill]]  ;;  %s124_s5 = int_to_ptr.vmem [resolvable:$true] %s123_s5 }
  0x18   :  { %129 = dma.hbm_to_vmem [thread:$0]  %s122_s26, 1024, %s124_s5, [#allocation15], %s1473_s19, %s1473_s19, %s1474_s1  }
  0x19   :  { %s56_s21 = sshll.u32 %s1654_s2, 4  ;;  %s1478_s23 = smov [#allocation2]   ;;  %s57_s21 = int_to_ptr.hbm [resolvable:$true] %s56_s21 }
  0x1a   :  { %s35_s3 = sshll.u32 %s1478_s23, 4  ;;  %s1479_s24 = smov [#allocation7]   ;;  %s36_s3 = int_to_ptr.vmem [resolvable:$true] %s35_s3 }
  0x1b   :  { %s58_s25 = sshll.u32 %s1479_s24, 4  ;;  %s82_s27 = sshll.u32 %s1656_s4, 4  ;;  %s59_s25 = int_to_ptr.vmem [resolvable:$true] %s58_s25  ;;  %s83_s27 = int_to_ptr.hbm [resolvable:$true] %s82_s27 }
  0x1c   :  { %64 = dma.hbm_to_vmem [thread:$0]  %s57_s21, 1024, %s59_s25, [#allocation6], %s1473_s19, %s1473_s19, %s1474_s1  }
  0x1d   :  { %s33_s22 = sshll.u32 %s1673_s20, 4  ;;  %s108_s2 = sshll.u32 %s1658_s6, 4  ;;  %s34_s22 = int_to_ptr.hbm [resolvable:$true] %s33_s22  ;;  %s109_s2 = int_to_ptr.hbm [resolvable:$true] %s108_s2 }
  0x1e   :  { %38 = dma.hbm_to_vmem [thread:$0]  %s34_s22, 64, %s36_s3, [#allocation3]  }
  0x1f   :  { %s1480_s29 = smov [#allocation10]   ;;  %s1481_s20 = smov [#allocation13]  }
  0x20   :  { %s84_s30 = sshll.u32 %s1480_s29, 4  ;;  %s110_s4 = sshll.u32 %s1481_s20, 4  ;;  %s85_s30 = int_to_ptr.vmem [resolvable:$true] %s84_s30  ;;  %s111_s4 = int_to_ptr.vmem [resolvable:$true] %s110_s4 }
  0x21   :  { %90 = dma.hbm_to_vmem [thread:$0]  %s83_s27, 1024, %s85_s30, [#allocation9], %s1473_s19, %s1473_s19, %s1474_s1  }
  0x22   :  { %s134_s18 = sshll.u32 %s1660_s8, 4  ;;  %s1482_s6 = smov [#allocation16]   ;;  %s135_s18 = int_to_ptr.hbm [resolvable:$true] %s134_s18 }
  0x23   :  { %116 = dma.hbm_to_vmem [thread:$0]  %s109_s2, 1024, %s111_s4, [#allocation12], %s1473_s19, %s1473_s19, %s1474_s1  }
  0x24   :  { %s136_s21 = sshll.u32 %s1482_s6, 4  ;;  %s137_s21 = int_to_ptr.vmem [resolvable:$true] %s136_s21 }
  0x25   :  { %142 = dma.hbm_to_vmem [thread:$0]  %s135_s18, 1024, %s137_s21, [#allocation15], %s1473_s19, %s1473_s19, %s1474_s1  }
  0x26   :  { %1460 = dma.done.wait [#allocation3], 64  }
  0x27   :  { %1461 = vsyncadd [#allocation3], 4294967232 }
  0x28   :  { %1462 = dma.done.wait [#allocation6], 2048  }
  0x29   :  { %1463 = vsyncadd [#allocation6], 4294965248 }
  0x2a   :  { %1464 = dma.done.wait [#allocation9], 2048  }
  0x2b   :  { %1465 = vsyncadd [#allocation9], 4294965248 }
  0x2c   :  { %1466 = dma.done.wait [#allocation12], 2048  }
  0x2d   :  { %1467 = vsyncadd [#allocation12], 4294965248 }
  0x2e   :  { %1468 = dma.done.wait [#allocation15], 2048  }
  0x2f   :  { %1469 = vsyncadd [#allocation15], 4294965248  ;;  %v1143_v0 = vld [vmem:[#allocation5 + $0x38] sm:$0xff]  ;;  %v1142_v1 = vld [vmem:[#allocation5 + $0x30] sm:$0xff]  ;;  %s1483_s26 = smov [#allocation17]   ;;  %s866_s30 = sshll.u32 %s1669_s17, 4  ;;  %s867_s30 = int_to_ptr.hbm [resolvable:$true] %s866_s30 }
  0x30   :  { %264 = vmatpush.bf16.msra.mxu0 %v1143_v0  ;;  %v1151_v2 = vld [vmem:[#allocation7 + $0x38] sm:$0xff]  ;;  %v1141_v3 = vld [vmem:[#allocation5 + $0x28] sm:$0xff]  ;;  %v1150_v4 = vld [vmem:[#allocation7 + $0x30] sm:$0xff]  ;;  %s864_s5 = sshll.u32 %s1483_s26, 4  ;;  %s865_s5 = int_to_ptr.vmem [resolvable:$true] %s864_s5 }
  0x31   :  { %347 = vmatpush.bf16.msra.mxu1 %v1151_v2  ;;  %v1149_v5 = vld [vmem:[#allocation7 + $0x28] sm:$0xff]  ;;  %v1140_v6 = vld [vmem:[#allocation5 + $0x20] sm:$0xff]  ;;  %v1139_v8 = vld [vmem:[#allocation5 + $0x18] sm:$0xff] }
  0x32   :  { %v1148_v7 = vld [vmem:[#allocation7 + $0x20] sm:$0xff]  ;;  %v1147_v9 = vld [vmem:[#allocation7 + $0x18] sm:$0xff]  ;;  %v1138_v10 = vld [vmem:[#allocation5 + $0x10] sm:$0xff] }
  0x33   :  { %v1146_v11 = vld [vmem:[#allocation7 + $0x10] sm:$0xff]  ;;  %v1137_v12 = vld [vmem:[#allocation5 + $0x8] sm:$0xff]  ;;  %v1136_v13 = vld [vmem:[#allocation5] sm:$0xff] }
  0x34   :  { %265 = vmatpush.bf16.msra.mxu0 %v1142_v1  ;;  %v195_v14 = vld [vmem:[#allocation2] sm:$0xf]  ;;  %v1145_v15 = vld [vmem:[#allocation7 + $0x8] sm:$0xff]  ;;  %v1144_v16 = vld [vmem:[#allocation7] sm:$0xff] }
  0x35   :  { %348 = vmatpush.bf16.msra.mxu1 %v1150_v4  ;;  %v1159_v17 = vld [vmem:[#allocation8 + $0x38] sm:$0xff]  ;;  %v1158_v18 = vld [vmem:[#allocation8 + $0x30] sm:$0xff]  ;;  %v1157_v19 = vld [vmem:[#allocation8 + $0x28] sm:$0xff] }
  0x36   :  { %430 = vmatpush.bf16.msra.mxu2 %v1159_v17  ;;  %v1156_v20 = vld [vmem:[#allocation8 + $0x20] sm:$0xff]  ;;  %v1155_v21 = vld [vmem:[#allocation8 + $0x18] sm:$0xff]  ;;  %v1154_v22 = vld [vmem:[#allocation8 + $0x10] sm:$0xff] }
  0x37   :  { %v1212_v23 = vld [vmem:[%s1661_s9] ss:$0 sm:$0xff]  ;;  %v1153_v29 = vld [vmem:[#allocation8 + $0x8] sm:$0xff]  ;;  %v1152_v30 = vld [vmem:[#allocation8] sm:$0xff] }
  0x38   :  { %266 = vmatpush.bf16.msra.mxu0 %v1141_v3  ;;  %v1167_v31 = vld [vmem:[#allocation10 + $0x38] sm:$0xff]  ;;  %v1166_v32 = vld [vmem:[#allocation10 + $0x30] sm:$0xff]  ;;  %v1165_v33 = vld [vmem:[#allocation10 + $0x28] sm:$0xff] }
  0x39   :  { %349 = vmatpush.bf16.msra.mxu1 %v1149_v5  ;;  %513 = vmatpush.bf16.msra.mxu3 %v1167_v31  ;;  %v1164_v34 = vld [vmem:[#allocation10 + $0x20] sm:$0xff]  ;;  %v1163_v35 = vld [vmem:[#allocation10 + $0x18] sm:$0xff]  ;;  %v1162_v36 = vld [vmem:[#allocation10 + $0x10] sm:$0xff] }
  0x3a   :  { %431 = vmatpush.bf16.msra.mxu2 %v1158_v18  ;;  %v1213_v37 = vld [vmem:[%s1662_s10] ss:$0 sm:$0xff]  ;;  %v1161_v43 = vld [vmem:[#allocation10 + $0x8] sm:$0xff]  ;;  %v1160_v44 = vld [vmem:[#allocation10] sm:$0xff] }
  0x3b   :  { %v1175_v45 = vld [vmem:[#allocation11 + $0x38] sm:$0xff]  ;;  %v1174_v46 = vld [vmem:[#allocation11 + $0x30] sm:$0xff]  ;;  %v1173_v47 = vld [vmem:[#allocation11 + $0x28] sm:$0xff] }
  0x3c   :  { %267 = vmatpush.bf16.msra.mxu0 %v1140_v6  ;;  %v1172_v48 = vld [vmem:[#allocation11 + $0x20] sm:$0xff]  ;;  %v1171_v49 = vld [vmem:[#allocation11 + $0x18] sm:$0xff]  ;;  %v1170_v50 = vld [vmem:[#allocation11 + $0x10] sm:$0xff] }
  0x3d   :  { %350 = vmatpush.bf16.msra.mxu1 %v1148_v7  ;;  %514 = vmatpush.bf16.msra.mxu3 %v1166_v32  ;;  %v1214_v51 = vld [vmem:[%s1663_s11] ss:$0 sm:$0xff]  ;;  %v1169_v57 = vld [vmem:[#allocation11 + $0x8] sm:$0xff]  ;;  %v1168_v58 = vld [vmem:[#allocation11] sm:$0xff] }
  0x3e   :  { %432 = vmatpush.bf16.msra.mxu2 %v1157_v19  ;;  %v1183_v59 = vld [vmem:[#allocation13 + $0x38] sm:$0xff]  ;;  %v1182_v60 = vld [vmem:[#allocation13 + $0x30] sm:$0xff]  ;;  %v1181_v61 = vld [vmem:[#allocation13 + $0x28] sm:$0xff] }
  0x3f   :  { %v1180_v62 = vld [vmem:[#allocation13 + $0x20] sm:$0xff]  ;;  %v1179_v63 = vld [vmem:[#allocation13 + $0x18] sm:$0xff]  ;;  %v1178_v0 = vld [vmem:[#allocation13 + $0x10] sm:$0xff] }
  0x40   :  { %268 = vmatpush.bf16.msra.mxu0 %v1139_v8  ;;  %v1215_v1 = vld [vmem:[%s1664_s12] ss:$0 sm:$0xff]  ;;  %v1177_v7 = vld [vmem:[#allocation13 + $0x8] sm:$0xff]  ;;  %v1176_v8 = vld [vmem:[#allocation13] sm:$0xff] }
  0x41   :  { %351 = vmatpush.bf16.msra.mxu1 %v1147_v9  ;;  %515 = vmatpush.bf16.msra.mxu3 %v1165_v33  ;;  %v1191_v9 = vld [vmem:[#allocation14 + $0x38] sm:$0xff] }
  0x42   :  { %433 = vmatpush.bf16.msra.mxu2 %v1156_v20 }
  0x44   :  { %269 = vmatpush.bf16.msra.mxu0 %v1138_v10  ;;  %v1190_v10 = vld [vmem:[#allocation14 + $0x30] sm:$0xff] }
  0x45   :  { %352 = vmatpush.bf16.msra.mxu1 %v1146_v11  ;;  %516 = vmatpush.bf16.msra.mxu3 %v1164_v34  ;;  %v1189_v11 = vld [vmem:[#allocation14 + $0x28] sm:$0xff] }
  0x46   :  { %434 = vmatpush.bf16.msra.mxu2 %v1155_v21  ;;  %v1185_v21 = vld [vmem:[#allocation14 + $0x8] sm:$0xff] }
  0x48   :  { %270 = vmatpush.bf16.msra.mxu0 %v1137_v12  ;;  %v1188_v12 = vld [vmem:[#allocation14 + $0x20] sm:$0xff] }
  0x49   :  { %353 = vmatpush.bf16.msra.mxu1 %v1145_v15  ;;  %517 = vmatpush.bf16.msra.mxu3 %v1163_v35  ;;  %v1216_v15 = vld [vmem:[%s1665_s13] ss:$0 sm:$0xff]  ;;  %v1193_v35 = vld [vmem:[#allocation16 + $0x8] sm:$0xff] }
  0x4a   :  { %435 = vmatpush.bf16.msra.mxu2 %v1154_v22  ;;  %v1184_v22 = vld [vmem:[#allocation14] sm:$0xff] }
  0x4c   :  { %271 = vmatpush.bf16.msra.mxu0 %v1136_v13  ;;  %v1187_v13 = vld [vmem:[#allocation14 + $0x18] sm:$0xff] }
  0x4d   :  { %354 = vmatpush.bf16.msra.mxu1 %v1144_v16  ;;  %518 = vmatpush.bf16.msra.mxu3 %v1162_v36  ;;  %v1192_v36 = vld [vmem:[#allocation16] sm:$0xff] }
  0x4e   :  { %436 = vmatpush.bf16.msra.mxu2 %v1153_v29  ;;  %v1217_v29 = vld [vmem:[%s1666_s14] ss:$0 sm:$0xff] }
  0x4f   :  { %272 = vmatmul.bf16.vlgmr.msra.gmra.mxu0 %v195_v14  ;;  %v1186_v14 = vld [vmem:[#allocation14 + $0x10] sm:$0xff] }
  0x50   :  { %596 = vmatpush.bf16.msrb.mxu0 %v1175_v45 }
  0x51   :  { %519 = vmatpush.bf16.msra.mxu3 %v1161_v43  ;;  %679 = vmatpush.bf16.msrb.mxu1 %v1183_v59  ;;  %v1219_v43 = vld [vmem:[%s1668_s16] ss:$0 sm:$0xff] }
  0x52   :  { %437 = vmatpush.bf16.msra.mxu2 %v1152_v30 }
  0x54   :  { %597 = vmatpush.bf16.msrb.mxu0 %v1174_v46 }
  0x55   :  { %520 = vmatpush.bf16.msra.mxu3 %v1160_v44  ;;  %680 = vmatpush.bf16.msrb.mxu1 %v1182_v60 }
  0x56   :  { %762 = vmatpush.bf16.msrb.mxu2 %v1191_v9 }
  0x58   :  { %598 = vmatpush.bf16.msrb.mxu0 %v1173_v47 }
  0x59   :  { %681 = vmatpush.bf16.msrb.mxu1 %v1181_v61 }
  0x5a   :  { %763 = vmatpush.bf16.msrb.mxu2 %v1190_v10 }
  0x5c   :  { %599 = vmatpush.bf16.msrb.mxu0 %v1172_v48 }
  0x5d   :  { %682 = vmatpush.bf16.msrb.mxu1 %v1180_v62 }
  0x5e   :  { %764 = vmatpush.bf16.msrb.mxu2 %v1189_v11 }
  0x60   :  { %600 = vmatpush.bf16.msrb.mxu0 %v1171_v49 }
  0x61   :  { %683 = vmatpush.bf16.msrb.mxu1 %v1179_v63 }
  0x62   :  { %765 = vmatpush.bf16.msrb.mxu2 %v1188_v12 }
  0x64   :  { %601 = vmatpush.bf16.msrb.mxu0 %v1170_v50 }
  0x65   :  { %684 = vmatpush.bf16.msrb.mxu1 %v1178_v0 }
  0x66   :  { %766 = vmatpush.bf16.msrb.mxu2 %v1187_v13 }
  0x68   :  { %602 = vmatpush.bf16.msrb.mxu0 %v1169_v57 }
  0x69   :  { %685 = vmatpush.bf16.msrb.mxu1 %v1177_v7 }
  0x6a   :  { %767 = vmatpush.bf16.msrb.mxu2 %v1186_v14 }
  0x6c   :  { %603 = vmatpush.bf16.msrb.mxu0 %v1168_v58 }
  0x6d   :  { %686 = vmatpush.bf16.msrb.mxu1 %v1176_v8 }
  0x6e   :  { %768 = vmatpush.bf16.msrb.mxu2 %v1185_v21 }
  0x72   :  { %769 = vmatpush.bf16.msrb.mxu2 %v1184_v22 }
  0xcc   :  { %v273_v24 = vpop.f32.mrf.mxu0 }
  0xcd   :  { %v274_v25 = vadd.f32 %v1212_v23, %v273_v24  ;;  %v1199_v23 = vld [vmem:[#allocation16 + $0x38] sm:$0xff]  ;;  %v1198_v24 = vld [vmem:[#allocation16 + $0x30] sm:$0xff] }
  0xce   :  { %845 = vmatpush.bf16.msrb.mxu3 %v1199_v23 }
  0xcf   :  { %v277_v26 = vmax.f32 %v274_v25, 0.0  ;;  %v1197_v25 = vld [vmem:[#allocation16 + $0x28] sm:$0xff] }
  0xd1   :  { %v278_v27 = vpack.c.bf16 %v277_v26, %v277_v26  ;;  %v1196_v26 = vld [vmem:[#allocation16 + $0x20] sm:$0xff] }
  0xd2   :  { %846 = vmatpush.bf16.msrb.mxu3 %v1198_v24 }
  0xd3   :  { %355 = vmatmul.bf16.vlgmr.msra.gmra.mxu1 %v278_v27  ;;  %v1195_v27 = vld [vmem:[#allocation16 + $0x18] sm:$0xff] }
  0xd4   :  { %v275_v28 = vpop.f32.mrf.mxu0 }
  0xd5   :  { %v1194_v28 = vld [vmem:[#allocation16 + $0x10] sm:$0xff] }
  0xd6   :  { %847 = vmatpush.bf16.msrb.mxu3 %v1197_v25 }
  0xda   :  { %848 = vmatpush.bf16.msrb.mxu3 %v1196_v26 }
  0xde   :  { %849 = vmatpush.bf16.msrb.mxu3 %v1195_v27 }
  0xe2   :  { %850 = vmatpush.bf16.msrb.mxu3 %v1194_v28 }
  0xe6   :  { %851 = vmatpush.bf16.msrb.mxu3 %v1193_v35 }
  0xea   :  { %852 = vmatpush.bf16.msrb.mxu3 %v1192_v36 }
 0x150   :  { %v356_v38 = vpop.f32.mrf.mxu1 }
 0x151   :  { %v357_v39 = vadd.f32 %v1213_v37, %v356_v38  ;;  %v1218_v37 = vld [vmem:[%s1667_s15] ss:$0 sm:$0xff] }
 0x153   :  { %v360_v40 = vmax.f32 %v357_v39, 0.0 }
 0x155   :  { %v361_v41 = vpack.c.bf16 %v360_v40, %v360_v40 }
 0x157   :  { %438 = vmatmul.bf16.vlgmr.msra.gmra.mxu2 %v361_v41 }
 0x158   :  { %v358_v42 = vpop.f32.mrf.mxu1 }
 0x1da   :  { %v439_v52 = vpop.f32.mrf.mxu2 }
 0x1db   :  { %v440_v53 = vadd.f32 %v1214_v51, %v439_v52 }
 0x1dd   :  { %v443_v54 = vmax.f32 %v440_v53, 0.0 }
 0x1df   :  { %v444_v55 = vpack.c.bf16 %v443_v54, %v443_v54 }
 0x1e1   :  { %521 = vmatmul.bf16.vlgmr.msra.gmra.mxu3 %v444_v55 }
 0x1e2   :  { %v441_v56 = vpop.f32.mrf.mxu2 }
 0x264   :  { %v522_v2 = vpop.f32.mrf.mxu3 }
 0x265   :  { %v523_v3 = vadd.f32 %v1215_v1, %v522_v2 }
 0x267   :  { %v526_v4 = vmax.f32 %v523_v3, 0.0 }
 0x269   :  { %v527_v5 = vpack.c.bf16 %v526_v4, %v526_v4 }
 0x26b   :  { %604 = vmatmul.bf16.vlgmr.msrb.gmra.mxu0 %v527_v5 }
 0x26c   :  { %v524_v6 = vpop.f32.mrf.mxu3 }
 0x2e8   :  { %v605_v16 = vpop.f32.mrf.mxu0 }
 0x2e9   :  { %v606_v17 = vadd.f32 %v1216_v15, %v605_v16 }
 0x2eb   :  { %v609_v18 = vmax.f32 %v606_v17, 0.0 }
 0x2ed   :  { %v610_v19 = vpack.c.bf16 %v609_v18, %v609_v18 }
 0x2ef   :  { %687 = vmatmul.bf16.vlgmr.msrb.gmra.mxu1 %v610_v19 }
 0x2f0   :  { %v607_v20 = vpop.f32.mrf.mxu0 }
 0x36c   :  { %v688_v30 = vpop.f32.mrf.mxu1 }
 0x36d   :  { %v689_v31 = vadd.f32 %v1217_v29, %v688_v30 }
 0x36f   :  { %v692_v32 = vmax.f32 %v689_v31, 0.0 }
 0x371   :  { %v693_v33 = vpack.c.bf16 %v692_v32, %v692_v32 }
 0x373   :  { %770 = vmatmul.bf16.vlgmr.msrb.gmra.mxu2 %v693_v33 }
 0x374   :  { %v690_v34 = vpop.f32.mrf.mxu1 }
 0x3f6   :  { %v771_v38 = vpop.f32.mrf.mxu2 }
 0x3f7   :  { %v772_v39 = vadd.f32 %v1218_v37, %v771_v38 }
 0x3f9   :  { %v775_v40 = vmax.f32 %v772_v39, 0.0 }
 0x3fb   :  { %v776_v41 = vpack.c.bf16 %v775_v40, %v775_v40 }
 0x3fd   :  { %853 = vmatmul.bf16.vlgmr.msrb.gmra.mxu3 %v776_v41 }
 0x3fe   :  { %v773_v42 = vpop.f32.mrf.mxu2 }
 0x480   :  { %v854_v44 = vpop.f32.mrf.mxu3 }
 0x481   :  { %v855_v45 = vadd.f32 %v1219_v43, %v854_v44 }
 0x483   :  { %858 = vst [vmem:[#allocation17] sm:$0xff] %v855_v45 }
 0x484   :  { %869 = dma.vmem_to_hbm [thread:$0]  %s865_s5, 128, %s867_s30, [#allocation4]  }
 0x488   :  { %v856_v46 = vpop.f32.mrf.mxu3 }
 0x489   :  { %1470 = dma.done.wait [#allocation4], 128  }
 0x48a   :  { %1471 = vsyncadd [#allocation4], 4294967168 }
 0x48b   :  { %874 = vsyncpa [#allocation3], 1 }
 0x48c   :  { %875 = vsyncpa [#allocation6], 1 }
 0x48d   :  { %876 = vsyncpa [#allocation9], 1 }
 0x48e   :  { %877 = vsyncpa [#allocation12], 1 }
 0x48f   :  { %878 = vsyncpa [#allocation15], 1 }
 0x490   :  { %879 = vsyncpa [#allocation4], 1 }

</bundles_post_ra>
